<compile_context>
chip_gen: v5e
topology: v5e:2x2
jax: 0.10.0
libtpu: 0.0.40
codegen_flags: <defaults>
</compile_context>

<pallas_src>
import functools
import math

import jax
import jax.numpy as jnp
from jax.experimental import pallas as pl
from jax.experimental.pallas import tpu as pltpu


_COMPILER_PARAMS = pltpu.CompilerParams(dimension_semantics=("parallel",))
_OFF = 128   # lane offset of the image inside the padded VMEM scratch (keeps stores 128-aligned)


def _round_up(x, m):
    return ((x + m - 1) // m) * m


# -----------------------------------------------------------------------------
# Fused residual-block kernel.
# Activations are (C, HW) tiles: channels on sublanes, flattened space on lanes.
# 3x3 taps come from a zero-padded flattened scratch:
#   scratch[:, _OFF + p] = x[:, p]
#   tap(dy,dx)[:, p]     = scratch[:, _OFF - (W+1) + dy*W + dx + p]
# Taps with dx==0 / dx==2 wrap across image rows at column 0 / W-1 and are masked.
# -----------------------------------------------------------------------------
def _residual_kernel(*refs, W, with_skip):
    if with_skip:
        (x_ref, w1_ref, sb1_ref, w2_ref, sb2_ref,
         wskip_ref, sbskip_ref, o_ref, xpad_ref) = refs
    else:
        (x_ref, w1_ref, sb1_ref, w2_ref, sb2_ref, o_ref, xpad_ref) = refs
        wskip_ref = sbskip_ref = None

    Cin, HW = x_ref.shape[1], x_ref.shape[2]
    Cout = o_ref.shape[1]
    base = _OFF - (W + 1)

    col = jax.lax.broadcasted_iota(jnp.int32, (1, HW), 1) % W
    not_left = col > 0           # valid positions for dx == 0 taps
    not_right = col < (W - 1)    # valid positions for dx == 2 taps

    def conv3x3(C, w_ref):
        acc = jnp.zeros((Cout, HW), jnp.float32)
        for dy in range(3):
            for dx in range(3):
                tap = xpad_ref[0:C, pl.ds(base + dy * W + dx, HW)]
                if dx == 0:
                    tap = jnp.where(not_left, tap, 0.0)
                elif dx == 2:
                    tap = jnp.where(not_right, tap, 0.0)
                acc = acc + jnp.dot(w_ref[dy * 3 + dx], tap,
                                    preferred_element_type=jnp.float32)
        return acc

    x = x_ref[0]                                          # (Cin, HW), stays resident

    # conv1 + BN + ReLU
    xpad_ref[...] = jnp.zeros_like(xpad_ref)
    xpad_ref[0:Cin, pl.ds(_OFF, HW)] = x
    h1 = conv3x3(Cin, w1_ref)
    h1 = jnp.maximum(h1 * sb1_ref[0] + sb1_ref[1], 0.0)   # (Cout, HW)

    # skip branch from the already-resident input (no extra HBM traffic)
    if with_skip:
        skip = jnp.dot(wskip_ref[...], x, preferred_element_type=jnp.float32)
        skip = skip * sbskip_ref[0] + sbskip_ref[1]
    else:
        skip = x                                          # Cin == Cout

    # conv2 + BN + skip + ReLU (reuse the padded scratch for h1)
    xpad_ref[0:Cout, pl.ds(_OFF, HW)] = h1
    h2 = conv3x3(Cout, w2_ref)
    h2 = h2 * sb2_ref[0] + sb2_ref[1]
    o_ref[0] = jnp.maximum(h2 + skip, 0.0)


def residual_block(x, H, W, p):
    """x: (N, Cin, H*W) -> (N, Cout, H*W); one fused pallas_call."""
    N, Cin, HW = x.shape
    Cout = p["w1"].shape[1]
    with_skip = "wskip" in p
    assert W + 1 <= _OFF
    Cmax = max(Cin, Cout)
    L = _round_up(_OFF + HW + W + 1, 128)

    in_specs = [
        pl.BlockSpec((1, Cin, HW), lambda n: (n, 0, 0)),
        pl.BlockSpec((9, Cout, Cin), lambda n: (0, 0, 0)),
        pl.BlockSpec((2, Cout, 1), lambda n: (0, 0, 0)),
        pl.BlockSpec((9, Cout, Cout), lambda n: (0, 0, 0)),
        pl.BlockSpec((2, Cout, 1), lambda n: (0, 0, 0)),
    ]
    args = [x, p["w1"], p["sb1"], p["w2"], p["sb2"]]
    if with_skip:
        in_specs += [pl.BlockSpec((Cout, Cin), lambda n: (0, 0)),
                     pl.BlockSpec((2, Cout, 1), lambda n: (0, 0, 0))]
        args += [p["wskip"], p["sbskip"]]

    return pl.pallas_call(
        functools.partial(_residual_kernel, W=W, with_skip=with_skip),
        out_shape=jax.ShapeDtypeStruct((N, Cout, HW), jnp.float32),
        grid=(N,),
        in_specs=in_specs,
        out_specs=pl.BlockSpec((1, Cout, HW), lambda n: (n, 0, 0)),
        scratch_shapes=[pltpu.VMEM((Cmax, L), jnp.float32)],
        compiler_params=_COMPILER_PARAMS,
    )(*args)


# -----------------------------------------------------------------------------
# MaxPool2d(2, 2): shifted elementwise max over the flat layout, then a one-hot
# selection matmul picks the 2x2-window max at every even/even anchor.
# -----------------------------------------------------------------------------
def _maxpool_kernel(x_ref, sel_ref, o_ref, buf_ref, *, W):
    C, HW = x_ref.shape[1], x_ref.shape[2]
    x = x_ref[0]
    buf_ref[...] = jnp.zeros_like(buf_ref)
    buf_ref[0:C, 0:HW] = x
    m = x
    for s in (1, W, W + 1):
        m = jnp.maximum(m, buf_ref[0:C, pl.ds(s, HW)])
    o_ref[0] = jnp.dot(m, sel_ref[...], preferred_element_type=jnp.float32)


def maxpool2x2(x, H, W):
    """(N, C, H*W) -> (N, C, (H//2)*(W//2))."""
    N, C, HW = x.shape
    assert H % 2 == 0 and W % 2 == 0
    Hh, Wh = H // 2, W // 2
    q = jnp.arange(Hh * Wh)
    anchor = (q // Wh) * (2 * W) + (q % Wh) * 2
    sel = jax.nn.one_hot(anchor, HW, dtype=jnp.float32).T          # (HW, Hh*Wh)
    L = _round_up(HW + W + 1, 128)
    return pl.pallas_call(
        functools.partial(_maxpool_kernel, W=W),
        out_shape=jax.ShapeDtypeStruct((N, C, Hh * Wh), jnp.float32),
        grid=(N,),
        in_specs=[pl.BlockSpec((1, C, HW), lambda n: (n, 0, 0)),
                  pl.BlockSpec((HW, Hh * Wh), lambda n: (0, 0))],
        out_specs=pl.BlockSpec((1, C, Hh * Wh), lambda n: (n, 0, 0)),
        scratch_shapes=[pltpu.VMEM((C, L), jnp.float32)],
        compiler_params=_COMPILER_PARAMS,
    )(x, sel)


# -----------------------------------------------------------------------------
# merg = up1 + nearest_x2_upsample(low3), fused: the upsample is a constant 0/1
# (HhWh, HW) matrix matmul, the add rides the VPU in the same kernel.
# -----------------------------------------------------------------------------
def _merge_kernel(up1_ref, low_ref, u_ref, o_ref):
    up2 = jnp.dot(low_ref[0], u_ref[...], preferred_element_type=jnp.float32)
    o_ref[0] = up1_ref[0] + up2


def merge_upsample_add(up1, low3, H, W):
    N, C, HW = up1.shape
    Hh, Wh = H // 2, W // 2
    p_idx = jnp.arange(HW)
    src = (p_idx // W // 2) * Wh + (p_idx % W) // 2
    u = jax.nn.one_hot(src, Hh * Wh, dtype=jnp.float32).T          # (Hh*Wh, HW)
    return pl.pallas_call(
        _merge_kernel,
        out_shape=jax.ShapeDtypeStruct((N, C, HW), jnp.float32),
        grid=(N,),
        in_specs=[pl.BlockSpec((1, C, HW), lambda n: (n, 0, 0)),
                  pl.BlockSpec((1, C, Hh * Wh), lambda n: (n, 0, 0)),
                  pl.BlockSpec((Hh * Wh, HW), lambda n: (0, 0))],
        out_specs=pl.BlockSpec((1, C, HW), lambda n: (n, 0, 0)),
        compiler_params=_COMPILER_PARAMS,
    )(up1, low3, u)


# -----------------------------------------------------------------------------
# saccade_module forward (mirrors the PyTorch control flow; per-op work in Pallas)
# -----------------------------------------------------------------------------
def _seq(x, H, W, plist):
    for p in plist:
        x = residual_block(x, H, W, p)
    return x


def saccade_forward(x, H, W, p):
    up1 = _seq(x, H, W, p["up1"])
    max1 = maxpool2x2(x, H, W)
    Hh, Wh = H // 2, W // 2
    low1 = _seq(max1, Hh, Wh, p["low1"])
    if p["n"] > 1:
        low2, mergs = saccade_forward(low1, Hh, Wh, p["low2"])
    else:
        low2, mergs = _seq(low1, Hh, Wh, p["low2"]), []
    low3 = _seq(low2, Hh, Wh, p["low3"])
    merg = merge_upsample_add(up1, low3, H, W)
    mergs.append(merg)
    return merg, mergs


# -----------------------------------------------------------------------------
# Deterministic parameter construction (shapes match the PyTorch module)
# -----------------------------------------------------------------------------
def _make_residual_params(key, cin, cout):
    ks = jax.random.split(key, 12)

    def bn(k1, k2, k3, c):
        gamma = 1.0 + 0.1 * jax.random.normal(k1, (c,), jnp.float32)
        beta = 0.1 * jax.random.normal(k2, (c,), jnp.float32)
        mean = 0.1 * jax.random.normal(k3, (c,), jnp.float32)
        var = jnp.ones((c,), jnp.float32)
        scale = gamma / jnp.sqrt(var + 1e-5)     # eval-mode BN folded to an affine
        bias = beta - mean * scale
        return jnp.stack([scale, bias]).reshape(2, c, 1)

    p = {}
    p["w1"] = jax.random.normal(ks[0], (9, cout, cin), jnp.float32) / math.sqrt(9 * cin)
    p["sb1"] = bn(ks[1], ks[2], ks[3], cout)
    p["w2"] = jax.random.normal(ks[4], (9, cout, cout), jnp.float32) / math.sqrt(9 * cout)
    p["sb2"] = bn(ks[5], ks[6], ks[7], cout)
    if cin != cout:
        p["wskip"] = jax.random.normal(ks[8], (cout, cin), jnp.float32) / math.sqrt(cin)
        p["sbskip"] = bn(ks[9], ks[10], ks[11], cout)
    return p


def _make_layer_params(key, inp, out, modules):
    ks = jax.random.split(key, modules)
    return ([_make_residual_params(ks[0], inp, out)]
            + [_make_residual_params(ks[i], out, out) for i in range(1, modules)])


def _make_layer_revr_params(key, inp, out, modules):
    ks = jax.random.split(key, modules)
    return ([_make_residual_params(ks[i], inp, inp) for i in range(modules - 1)]
            + [_make_residual_params(ks[modules - 1], inp, out)])


def make_saccade_params(key, n, dims, modules):
    curr_mod, next_mod = modules[0], modules[1]
    curr_dim, next_dim = dims[0], dims[1]
    k1, k2, k3, k4 = jax.random.split(key, 4)
    p = {"n": n}
    p["up1"] = _make_layer_params(k1, curr_dim, curr_dim, curr_mod)
    p["low1"] = _make_layer_params(k2, curr_dim, next_dim, curr_mod)
    if n > 1:
        p["low2"] = make_saccade_params(k3, n - 1, dims[1:], modules[1:])
    else:
        p["low2"] = _make_layer_params(k3, next_dim, next_dim, next_mod)
    p["low3"] = _make_layer_revr_params(k4, next_dim, curr_dim, curr_mod)
    return p


# -----------------------------------------------------------------------------
# Pure-JAX (XLA) reference in NCHW, for the correctness check only
# -----------------------------------------------------------------------------
def _affine_ref(y, sb):
    return y * sb[0, :, 0][None, :, None, None] + sb[1, :, 0][None, :, None, None]


def _conv3x3_ref(x, w, sb):
    w4 = w.reshape(3, 3, w.shape[1], w.shape[2]).transpose(2, 3, 0, 1)   # OIHW
    y = jax.lax.conv_general_dilated(
        x, w4, (1, 1), "SAME", dimension_numbers=("NCHW", "OIHW", "NCHW"),
        precision=jax.lax.Precision.HIGHEST)
    return _affine_ref(y, sb)


def _conv1x1_ref(x, w, sb):
    y = jax.lax.conv_general_dilated(
        x, w[:, :, None, None], (1, 1), "SAME",
        dimension_numbers=("NCHW", "OIHW", "NCHW"),
        precision=jax.lax.Precision.HIGHEST)
    return _affine_ref(y, sb)


def _residual_ref(x, p):
    h = jnp.maximum(_conv3x3_ref(x, p["w1"], p["sb1"]), 0.0)
    h2 = _conv3x3_ref(h, p["w2"], p["sb2"])
    skip = _conv1x1_ref(x, p["wskip"], p["sbskip"]) if "wskip" in p else x
    return jnp.maximum(h2 + skip, 0.0)


def _seq_ref(x, plist):
    for p in plist:
        x = _residual_ref(x, p)
    return x


def _maxpool_ref(x):
    N, C, H, W = x.shape
    return x.reshape(N, C, H // 2, 2, W // 2, 2).max(axis=(3, 5))


def _saccade_ref(x, p):
    up1 = _seq_ref(x, p["up1"])
    low1 = _seq_ref(_maxpool_ref(x), p["low1"])
    if p["n"] > 1:
        low2, mergs = _saccade_ref(low1, p["low2"])
    else:
        low2, mergs = _seq_ref(low1, p["low2"]), []
    low3 = _seq_ref(low2, p["low3"])
    up2 = jnp.repeat(jnp.repeat(low3, 2, axis=2), 2, axis=3)
    merg = up1 + up2
    mergs.append(merg)
    return merg, mergs


# -----------------------------------------------------------------------------
if __name__ == "__main__":
    key = jax.random.PRNGKey(0)
    kx, kp = jax.random.split(key)

    # saccade_module(n=2, dims=(4, 6, 8), modules=(1, 1, 1)) on a (2, 4, 16, 16) input
    N, C, H, W = 2, 4, 16, 16
    n, dims, modules = 2, (4, 6, 8), (1, 1, 1)

    x_nchw = jax.random.normal(kx, (N, C, H, W), jnp.float32)   # PyTorch NCHW input
    params = make_saccade_params(kp, n, dims, modules)

    # channels-first flattened layout: a free reshape of the NCHW input
    x = x_nchw.reshape(N, C, H * W)
    merg, mergs = saccade_forward(x, H, W, params)
    merg = jax.block_until_ready(merg).reshape(N, C, H, W)      # back to NCHW

    # correctness check against the pure-JAX reference
    merg_ref, mergs_ref = _saccade_ref(x_nchw, params)
    err = float(jnp.max(jnp.abs(merg - merg_ref)))
    # tolerance covers MXU bf16-pass rounding at default matmul precision
    assert err < 5e-2, f"final merge mismatch vs reference: {err}"
    err0 = float(jnp.max(jnp.abs(
        mergs[0].reshape(N, dims[1], H // 2, W // 2) - mergs_ref[0])))
    assert err0 < 5e-2, f"inner merge mismatch vs reference: {err0}"
    assert len(mergs) == len(mergs_ref) == n
    assert merg.shape == (N, C, H, W)

    print("KERNEL_OK")
</pallas_src>

<mosaic_0001>
module attributes {stable_mosaic.version = 11 : i64} {
  func.func @_residual_kernel(%arg0: i32, %arg1: memref<1x4x256xf32, #tpu.memory_space<vmem>>, %arg2: memref<9x4x4xf32, #tpu.memory_space<vmem>>, %arg3: memref<2x4x1xf32, #tpu.memory_space<vmem>>, %arg4: memref<9x4x4xf32, #tpu.memory_space<vmem>>, %arg5: memref<2x4x1xf32, #tpu.memory_space<vmem>>, %arg6: memref<1x4x256xf32, #tpu.memory_space<vmem>>, %arg7: memref<4x512xf32, #tpu.memory_space<vmem>>) attributes {dimension_semantics = [#tpu.dimension_semantics<parallel>], iteration_bounds = array<i64: 2>, scalar_prefetch = 0 : i64, scratch_operands = 1 : i64, tpu.core_type = #tpu.core_type<tc>, window_params = [{transform_indices = @transform_0, window_bounds = array<i64: 1, 4, 256>}, {pipeline_mode = #tpu.pipeline_mode<synchronous>, transform_indices = @transform_1, window_bounds = array<i64: 9, 4, 4>}, {pipeline_mode = #tpu.pipeline_mode<synchronous>, transform_indices = @transform_2, window_bounds = array<i64: 2, 4, 1>}, {pipeline_mode = #tpu.pipeline_mode<synchronous>, transform_indices = @transform_3, window_bounds = array<i64: 9, 4, 4>}, {pipeline_mode = #tpu.pipeline_mode<synchronous>, transform_indices = @transform_4, window_bounds = array<i64: 2, 4, 1>}, {transform_indices = @transform_5, window_bounds = array<i64: 1, 4, 256>}]} {
    %0 = tpu.iota {dimensions = array<i32: 1>} : vector<1x256xi32>
    %c16_i32 = arith.constant 16 : i32
    %c0_i32 = arith.constant 0 : i32
    %1 = arith.cmpi eq, %c16_i32, %c0_i32 : i32
    %c1_i32 = arith.constant 1 : i32
    %2 = arith.select %1, %c1_i32, %c16_i32 : i32
    %3 = vector.broadcast %2 : i32 to vector<1x256xi32>
    %4 = arith.remsi %0, %3 : vector<1x256xi32>
    %c0_i32_0 = arith.constant 0 : i32
    %5 = vector.broadcast %c0_i32_0 : i32 to vector<1x256xi32>
    %6 = arith.cmpi ne, %4, %5 : vector<1x256xi32>
    %c0_i32_1 = arith.constant 0 : i32
    %7 = vector.broadcast %c0_i32_1 : i32 to vector<1x256xi32>
    %8 = arith.cmpi slt, %4, %7 : vector<1x256xi32>
    %c0_i32_2 = arith.constant 0 : i32
    %9 = arith.cmpi slt, %2, %c0_i32_2 : i32
    %10 = vector.broadcast %9 : i1 to vector<1x256xi1>
    %11 = vector.broadcast %10 : vector<1x256xi1> to vector<1x256xi1>
    %12 = arith.xori %8, %11 : vector<1x256xi1>
    %13 = arith.andi %12, %6 : vector<1x256xi1>
    %14 = vector.broadcast %2 : i32 to vector<1x256xi32>
    %15 = arith.addi %4, %14 : vector<1x256xi32>
    %16 = arith.select %13, %15, %4 : vector<1x256xi1>, vector<1x256xi32>
    %c0_i32_3 = arith.constant 0 : i32
    %17 = vector.broadcast %c0_i32_3 : i32 to vector<1x256xi32>
    %18 = arith.cmpi sgt, %16, %17 : vector<1x256xi32>
    %c15_i32 = arith.constant 15 : i32
    %19 = vector.broadcast %c15_i32 : i32 to vector<1x256xi32>
    %20 = arith.cmpi slt, %16, %19 : vector<1x256xi32>
    %c0 = arith.constant 0 : index
    %c0_4 = arith.constant 0 : index
    %c0_5 = arith.constant 0 : index
    %21 = vector.load %arg1[%c0, %c0_4, %c0_5] : memref<1x4x256xf32, #tpu.memory_space<vmem>>, vector<1x4x256xf32>
    %22 = vector.shape_cast %21 : vector<1x4x256xf32> to vector<4x256xf32>
    %cst = arith.constant 0.000000e+00 : f32
    %23 = vector.broadcast %cst : f32 to vector<4x512xf32>
    %c0_6 = arith.constant 0 : index
    %c0_7 = arith.constant 0 : index
    %24 = vector.load %arg7[%c0_6, %c0_7] : memref<4x512xf32, #tpu.memory_space<vmem>>, vector<4x512xf32>
    tpu.vector_store %arg7[%c0_6, %c0_7], %23 {strides = array<i32>} : memref<4x512xf32, #tpu.memory_space<vmem>>, vector<4x512xf32>,
    %c0_8 = arith.constant 0 : index
    %c128 = arith.constant 128 : index
    %25 = vector.load %arg7[%c0_8, %c128] : memref<4x512xf32, #tpu.memory_space<vmem>>, vector<4x256xf32>
    tpu.vector_store %arg7[%c0_8, %c128], %22 {strides = array<i32>} : memref<4x512xf32, #tpu.memory_space<vmem>>, vector<4x256xf32>,
    %cst_9 = arith.constant 0.000000e+00 : f32
    %26 = vector.broadcast %cst_9 : f32 to vector<4x256xf32>
    %c0_10 = arith.constant 0 : index
    %c111 = arith.constant 111 : index
    %27 = vector.load %arg7[%c0_10, %c111] : memref<4x512xf32, #tpu.memory_space<vmem>>, vector<4x256xf32>
    %cst_11 = arith.constant 0.000000e+00 : f32
    %28 = vector.shape_cast %18 : vector<1x256xi1> to vector<1x256xi1>
    %29 = vector.broadcast %28 : vector<1x256xi1> to vector<4x256xi1>
    %30 = vector.broadcast %cst_11 : f32 to vector<4x256xf32>
    %31 = arith.select %29, %27, %30 : vector<4x256xi1>, vector<4x256xf32>
    %c0_12 = arith.constant 0 : index
    %c0_13 = arith.constant 0 : index
    %c0_14 = arith.constant 0 : index
    %32 = vector.load %arg2[%c0_12, %c0_13, %c0_14] : memref<9x4x4xf32, #tpu.memory_space<vmem>>, vector<1x4x4xf32>
    %33 = vector.shape_cast %32 : vector<1x4x4xf32> to vector<4x4xf32>
    %cst_15 = arith.constant dense<0.000000e+00> : vector<4x256xf32>
    %34 = tpu.matmul %33, %31, %cst_15 {dimension_numbers = #tpu.dot_dimension_numbers<[1], [0], [0], [1], [0, 0, 1, 1], [], []>} : vector<4x4xf32>, vector<4x256xf32>, vector<4x256xf32> -> vector<4x256xf32>
    %35 = arith.addf %26, %34 : vector<4x256xf32>
    %c0_16 = arith.constant 0 : index
    %c112 = arith.constant 112 : index
    %36 = vector.load %arg7[%c0_16, %c112] : memref<4x512xf32, #tpu.memory_space<vmem>>, vector<4x256xf32>
    %c1 = arith.constant 1 : index
    %c0_17 = arith.constant 0 : index
    %c0_18 = arith.constant 0 : index
    %37 = vector.load %arg2[%c1, %c0_17, %c0_18] : memref<9x4x4xf32, #tpu.memory_space<vmem>>, vector<1x4x4xf32>
    %38 = vector.shape_cast %37 : vector<1x4x4xf32> to vector<4x4xf32>
    %cst_19 = arith.constant dense<0.000000e+00> : vector<4x256xf32>
    %39 = tpu.matmul %38, %36, %cst_19 {dimension_numbers = #tpu.dot_dimension_numbers<[1], [0], [0], [1], [0, 0, 1, 1], [], []>} : vector<4x4xf32>, vector<4x256xf32>, vector<4x256xf32> -> vector<4x256xf32>
    %40 = arith.addf %35, %39 : vector<4x256xf32>
    %c0_20 = arith.constant 0 : index
    %c113 = arith.constant 113 : index
    %41 = vector.load %arg7[%c0_20, %c113] : memref<4x512xf32, #tpu.memory_space<vmem>>, vector<4x256xf32>
    %cst_21 = arith.constant 0.000000e+00 : f32
    %42 = vector.shape_cast %20 : vector<1x256xi1> to vector<1x256xi1>
    %43 = vector.broadcast %42 : vector<1x256xi1> to vector<4x256xi1>
    %44 = vector.broadcast %cst_21 : f32 to vector<4x256xf32>
    %45 = arith.select %43, %41, %44 : vector<4x256xi1>, vector<4x256xf32>
    %c2 = arith.constant 2 : index
    %c0_22 = arith.constant 0 : index
    %c0_23 = arith.constant 0 : index
    %46 = vector.load %arg2[%c2, %c0_22, %c0_23] : memref<9x4x4xf32, #tpu.memory_space<vmem>>, vector<1x4x4xf32>
    %47 = vector.shape_cast %46 : vector<1x4x4xf32> to vector<4x4xf32>
    %cst_24 = arith.constant dense<0.000000e+00> : vector<4x256xf32>
    %48 = tpu.matmul %47, %45, %cst_24 {dimension_numbers = #tpu.dot_dimension_numbers<[1], [0], [0], [1], [0, 0, 1, 1], [], []>} : vector<4x4xf32>, vector<4x256xf32>, vector<4x256xf32> -> vector<4x256xf32>
    %49 = arith.addf %40, %48 : vector<4x256xf32>
    %c0_25 = arith.constant 0 : index
    %c127 = arith.constant 127 : index
    %50 = vector.load %arg7[%c0_25, %c127] : memref<4x512xf32, #tpu.memory_space<vmem>>, vector<4x256xf32>
    %cst_26 = arith.constant 0.000000e+00 : f32
    %51 = vector.shape_cast %18 : vector<1x256xi1> to vector<1x256xi1>
    %52 = vector.broadcast %51 : vector<1x256xi1> to vector<4x256xi1>
    %53 = vector.broadcast %cst_26 : f32 to vector<4x256xf32>
    %54 = arith.select %52, %50, %53 : vector<4x256xi1>, vector<4x256xf32>
    %c3 = arith.constant 3 : index
    %c0_27 = arith.constant 0 : index
    %c0_28 = arith.constant 0 : index
    %55 = vector.load %arg2[%c3, %c0_27, %c0_28] : memref<9x4x4xf32, #tpu.memory_space<vmem>>, vector<1x4x4xf32>
    %56 = vector.shape_cast %55 : vector<1x4x4xf32> to vector<4x4xf32>
    %cst_29 = arith.constant dense<0.000000e+00> : vector<4x256xf32>
    %57 = tpu.matmul %56, %54, %cst_29 {dimension_numbers = #tpu.dot_dimension_numbers<[1], [0], [0], [1], [0, 0, 1, 1], [], []>} : vector<4x4xf32>, vector<4x256xf32>, vector<4x256xf32> -> vector<4x256xf32>
    %58 = arith.addf %49, %57 : vector<4x256xf32>
    %c0_30 = arith.constant 0 : index
    %c128_31 = arith.constant 128 : index
    %59 = vector.load %arg7[%c0_30, %c128_31] : memref<4x512xf32, #tpu.memory_space<vmem>>, vector<4x256xf32>
    %c4 = arith.constant 4 : index
    %c0_32 = arith.constant 0 : index
    %c0_33 = arith.constant 0 : index
    %60 = vector.load %arg2[%c4, %c0_32, %c0_33] : memref<9x4x4xf32, #tpu.memory_space<vmem>>, vector<1x4x4xf32>
    %61 = vector.shape_cast %60 : vector<1x4x4xf32> to vector<4x4xf32>
    %cst_34 = arith.constant dense<0.000000e+00> : vector<4x256xf32>
    %62 = tpu.matmul %61, %59, %cst_34 {dimension_numbers = #tpu.dot_dimension_numbers<[1], [0], [0], [1], [0, 0, 1, 1], [], []>} : vector<4x4xf32>, vector<4x256xf32>, vector<4x256xf32> -> vector<4x256xf32>
    %63 = arith.addf %58, %62 : vector<4x256xf32>
    %c0_35 = arith.constant 0 : index
    %c129 = arith.constant 129 : index
    %64 = vector.load %arg7[%c0_35, %c129] : memref<4x512xf32, #tpu.memory_space<vmem>>, vector<4x256xf32>
    %cst_36 = arith.constant 0.000000e+00 : f32
    %65 = vector.shape_cast %20 : vector<1x256xi1> to vector<1x256xi1>
    %66 = vector.broadcast %65 : vector<1x256xi1> to vector<4x256xi1>
    %67 = vector.broadcast %cst_36 : f32 to vector<4x256xf32>
    %68 = arith.select %66, %64, %67 : vector<4x256xi1>, vector<4x256xf32>
    %c5 = arith.constant 5 : index
    %c0_37 = arith.constant 0 : index
    %c0_38 = arith.constant 0 : index
    %69 = vector.load %arg2[%c5, %c0_37, %c0_38] : memref<9x4x4xf32, #tpu.memory_space<vmem>>, vector<1x4x4xf32>
    %70 = vector.shape_cast %69 : vector<1x4x4xf32> to vector<4x4xf32>
    %cst_39 = arith.constant dense<0.000000e+00> : vector<4x256xf32>
    %71 = tpu.matmul %70, %68, %cst_39 {dimension_numbers = #tpu.dot_dimension_numbers<[1], [0], [0], [1], [0, 0, 1, 1], [], []>} : vector<4x4xf32>, vector<4x256xf32>, vector<4x256xf32> -> vector<4x256xf32>
    %72 = arith.addf %63, %71 : vector<4x256xf32>
    %c0_40 = arith.constant 0 : index
    %c143 = arith.constant 143 : index
    %73 = vector.load %arg7[%c0_40, %c143] : memref<4x512xf32, #tpu.memory_space<vmem>>, vector<4x256xf32>
    %cst_41 = arith.constant 0.000000e+00 : f32
    %74 = vector.shape_cast %18 : vector<1x256xi1> to vector<1x256xi1>
    %75 = vector.broadcast %74 : vector<1x256xi1> to vector<4x256xi1>
    %76 = vector.broadcast %cst_41 : f32 to vector<4x256xf32>
    %77 = arith.select %75, %73, %76 : vector<4x256xi1>, vector<4x256xf32>
    %c6 = arith.constant 6 : index
    %c0_42 = arith.constant 0 : index
    %c0_43 = arith.constant 0 : index
    %78 = vector.load %arg2[%c6, %c0_42, %c0_43] : memref<9x4x4xf32, #tpu.memory_space<vmem>>, vector<1x4x4xf32>
    %79 = vector.shape_cast %78 : vector<1x4x4xf32> to vector<4x4xf32>
    %cst_44 = arith.constant dense<0.000000e+00> : vector<4x256xf32>
    %80 = tpu.matmul %79, %77, %cst_44 {dimension_numbers = #tpu.dot_dimension_numbers<[1], [0], [0], [1], [0, 0, 1, 1], [], []>} : vector<4x4xf32>, vector<4x256xf32>, vector<4x256xf32> -> vector<4x256xf32>
    %81 = arith.addf %72, %80 : vector<4x256xf32>
    %c0_45 = arith.constant 0 : index
    %c144 = arith.constant 144 : index
    %82 = vector.load %arg7[%c0_45, %c144] : memref<4x512xf32, #tpu.memory_space<vmem>>, vector<4x256xf32>
    %c7 = arith.constant 7 : index
    %c0_46 = arith.constant 0 : index
    %c0_47 = arith.constant 0 : index
    %83 = vector.load %arg2[%c7, %c0_46, %c0_47] : memref<9x4x4xf32, #tpu.memory_space<vmem>>, vector<1x4x4xf32>
    %84 = vector.shape_cast %83 : vector<1x4x4xf32> to vector<4x4xf32>
    %cst_48 = arith.constant dense<0.000000e+00> : vector<4x256xf32>
    %85 = tpu.matmul %84, %82, %cst_48 {dimension_numbers = #tpu.dot_dimension_numbers<[1], [0], [0], [1], [0, 0, 1, 1], [], []>} : vector<4x4xf32>, vector<4x256xf32>, vector<4x256xf32> -> vector<4x256xf32>
    %86 = arith.addf %81, %85 : vector<4x256xf32>
    %c0_49 = arith.constant 0 : index
    %c145 = arith.constant 145 : index
    %87 = vector.load %arg7[%c0_49, %c145] : memref<4x512xf32, #tpu.memory_space<vmem>>, vector<4x256xf32>
    %cst_50 = arith.constant 0.000000e+00 : f32
    %88 = vector.shape_cast %20 : vector<1x256xi1> to vector<1x256xi1>
    %89 = vector.broadcast %88 : vector<1x256xi1> to vector<4x256xi1>
    %90 = vector.broadcast %cst_50 : f32 to vector<4x256xf32>
    %91 = arith.select %89, %87, %90 : vector<4x256xi1>, vector<4x256xf32>
    %c8 = arith.constant 8 : index
    %c0_51 = arith.constant 0 : index
    %c0_52 = arith.constant 0 : index
    %92 = vector.load %arg2[%c8, %c0_51, %c0_52] : memref<9x4x4xf32, #tpu.memory_space<vmem>>, vector<1x4x4xf32>
    %93 = vector.shape_cast %92 : vector<1x4x4xf32> to vector<4x4xf32>
    %cst_53 = arith.constant dense<0.000000e+00> : vector<4x256xf32>
    %94 = tpu.matmul %93, %91, %cst_53 {dimension_numbers = #tpu.dot_dimension_numbers<[1], [0], [0], [1], [0, 0, 1, 1], [], []>} : vector<4x4xf32>, vector<4x256xf32>, vector<4x256xf32> -> vector<4x256xf32>
    %95 = arith.addf %86, %94 : vector<4x256xf32>
    %c0_54 = arith.constant 0 : index
    %c0_55 = arith.constant 0 : index
    %c0_56 = arith.constant 0 : index
    %96 = vector.load %arg3[%c0_54, %c0_55, %c0_56] : memref<2x4x1xf32, #tpu.memory_space<vmem>>, vector<1x4x1xf32>
    %97 = vector.shape_cast %96 : vector<1x4x1xf32> to vector<4x1xf32>
    %98 = vector.broadcast %97 : vector<4x1xf32> to vector<4x256xf32>
    %99 = arith.mulf %95, %98 : vector<4x256xf32>
    %c1_57 = arith.constant 1 : index
    %c0_58 = arith.constant 0 : index
    %c0_59 = arith.constant 0 : index
    %100 = vector.load %arg3[%c1_57, %c0_58, %c0_59] : memref<2x4x1xf32, #tpu.memory_space<vmem>>, vector<1x4x1xf32>
    %101 = vector.shape_cast %100 : vector<1x4x1xf32> to vector<4x1xf32>
    %102 = vector.broadcast %101 : vector<4x1xf32> to vector<4x256xf32>
    %103 = arith.addf %99, %102 : vector<4x256xf32>
    %cst_60 = arith.constant 0.000000e+00 : f32
    %104 = vector.broadcast %cst_60 : f32 to vector<4x256xf32>
    %105 = arith.maximumf %103, %104 : vector<4x256xf32>
    %c0_61 = arith.constant 0 : index
    %c128_62 = arith.constant 128 : index
    %106 = vector.load %arg7[%c0_61, %c128_62] : memref<4x512xf32, #tpu.memory_space<vmem>>, vector<4x256xf32>
    tpu.vector_store %arg7[%c0_61, %c128_62], %105 {strides = array<i32>} : memref<4x512xf32, #tpu.memory_space<vmem>>, vector<4x256xf32>,
    %cst_63 = arith.constant 0.000000e+00 : f32
    %107 = vector.broadcast %cst_63 : f32 to vector<4x256xf32>
    %c0_64 = arith.constant 0 : index
    %c111_65 = arith.constant 111 : index
    %108 = vector.load %arg7[%c0_64, %c111_65] : memref<4x512xf32, #tpu.memory_space<vmem>>, vector<4x256xf32>
    %cst_66 = arith.constant 0.000000e+00 : f32
    %109 = vector.shape_cast %18 : vector<1x256xi1> to vector<1x256xi1>
    %110 = vector.broadcast %109 : vector<1x256xi1> to vector<4x256xi1>
    %111 = vector.broadcast %cst_66 : f32 to vector<4x256xf32>
    %112 = arith.select %110, %108, %111 : vector<4x256xi1>, vector<4x256xf32>
    %c0_67 = arith.constant 0 : index
    %c0_68 = arith.constant 0 : index
    %c0_69 = arith.constant 0 : index
    %113 = vector.load %arg4[%c0_67, %c0_68, %c0_69] : memref<9x4x4xf32, #tpu.memory_space<vmem>>, vector<1x4x4xf32>
    %114 = vector.shape_cast %113 : vector<1x4x4xf32> to vector<4x4xf32>
    %cst_70 = arith.constant dense<0.000000e+00> : vector<4x256xf32>
    %115 = tpu.matmul %114, %112, %cst_70 {dimension_numbers = #tpu.dot_dimension_numbers<[1], [0], [0], [1], [0, 0, 1, 1], [], []>} : vector<4x4xf32>, vector<4x256xf32>, vector<4x256xf32> -> vector<4x256xf32>
    %116 = arith.addf %107, %115 : vector<4x256xf32>
    %c0_71 = arith.constant 0 : index
    %c112_72 = arith.constant 112 : index
    %117 = vector.load %arg7[%c0_71, %c112_72] : memref<4x512xf32, #tpu.memory_space<vmem>>, vector<4x256xf32>
    %c1_73 = arith.constant 1 : index
    %c0_74 = arith.constant 0 : index
    %c0_75 = arith.constant 0 : index
    %118 = vector.load %arg4[%c1_73, %c0_74, %c0_75] : memref<9x4x4xf32, #tpu.memory_space<vmem>>, vector<1x4x4xf32>
    %119 = vector.shape_cast %118 : vector<1x4x4xf32> to vector<4x4xf32>
    %cst_76 = arith.constant dense<0.000000e+00> : vector<4x256xf32>
    %120 = tpu.matmul %119, %117, %cst_76 {dimension_numbers = #tpu.dot_dimension_numbers<[1], [0], [0], [1], [0, 0, 1, 1], [], []>} : vector<4x4xf32>, vector<4x256xf32>, vector<4x256xf32> -> vector<4x256xf32>
    %121 = arith.addf %116, %120 : vector<4x256xf32>
    %c0_77 = arith.constant 0 : index
    %c113_78 = arith.constant 113 : index
    %122 = vector.load %arg7[%c0_77, %c113_78] : memref<4x512xf32, #tpu.memory_space<vmem>>, vector<4x256xf32>
    %cst_79 = arith.constant 0.000000e+00 : f32
    %123 = vector.shape_cast %20 : vector<1x256xi1> to vector<1x256xi1>
    %124 = vector.broadcast %123 : vector<1x256xi1> to vector<4x256xi1>
    %125 = vector.broadcast %cst_79 : f32 to vector<4x256xf32>
    %126 = arith.select %124, %122, %125 : vector<4x256xi1>, vector<4x256xf32>
    %c2_80 = arith.constant 2 : index
    %c0_81 = arith.constant 0 : index
    %c0_82 = arith.constant 0 : index
    %127 = vector.load %arg4[%c2_80, %c0_81, %c0_82] : memref<9x4x4xf32, #tpu.memory_space<vmem>>, vector<1x4x4xf32>
    %128 = vector.shape_cast %127 : vector<1x4x4xf32> to vector<4x4xf32>
    %cst_83 = arith.constant dense<0.000000e+00> : vector<4x256xf32>
    %129 = tpu.matmul %128, %126, %cst_83 {dimension_numbers = #tpu.dot_dimension_numbers<[1], [0], [0], [1], [0, 0, 1, 1], [], []>} : vector<4x4xf32>, vector<4x256xf32>, vector<4x256xf32> -> vector<4x256xf32>
    %130 = arith.addf %121, %129 : vector<4x256xf32>
    %c0_84 = arith.constant 0 : index
    %c127_85 = arith.constant 127 : index
    %131 = vector.load %arg7[%c0_84, %c127_85] : memref<4x512xf32, #tpu.memory_space<vmem>>, vector<4x256xf32>
    %cst_86 = arith.constant 0.000000e+00 : f32
    %132 = vector.shape_cast %18 : vector<1x256xi1> to vector<1x256xi1>
    %133 = vector.broadcast %132 : vector<1x256xi1> to vector<4x256xi1>
    %134 = vector.broadcast %cst_86 : f32 to vector<4x256xf32>
    %135 = arith.select %133, %131, %134 : vector<4x256xi1>, vector<4x256xf32>
    %c3_87 = arith.constant 3 : index
    %c0_88 = arith.constant 0 : index
    %c0_89 = arith.constant 0 : index
    %136 = vector.load %arg4[%c3_87, %c0_88, %c0_89] : memref<9x4x4xf32, #tpu.memory_space<vmem>>, vector<1x4x4xf32>
    %137 = vector.shape_cast %136 : vector<1x4x4xf32> to vector<4x4xf32>
    %cst_90 = arith.constant dense<0.000000e+00> : vector<4x256xf32>
    %138 = tpu.matmul %137, %135, %cst_90 {dimension_numbers = #tpu.dot_dimension_numbers<[1], [0], [0], [1], [0, 0, 1, 1], [], []>} : vector<4x4xf32>, vector<4x256xf32>, vector<4x256xf32> -> vector<4x256xf32>
    %139 = arith.addf %130, %138 : vector<4x256xf32>
    %c0_91 = arith.constant 0 : index
    %c128_92 = arith.constant 128 : index
    %140 = vector.load %arg7[%c0_91, %c128_92] : memref<4x512xf32, #tpu.memory_space<vmem>>, vector<4x256xf32>
    %c4_93 = arith.constant 4 : index
    %c0_94 = arith.constant 0 : index
    %c0_95 = arith.constant 0 : index
    %141 = vector.load %arg4[%c4_93, %c0_94, %c0_95] : memref<9x4x4xf32, #tpu.memory_space<vmem>>, vector<1x4x4xf32>
    %142 = vector.shape_cast %141 : vector<1x4x4xf32> to vector<4x4xf32>
    %cst_96 = arith.constant dense<0.000000e+00> : vector<4x256xf32>
    %143 = tpu.matmul %142, %140, %cst_96 {dimension_numbers = #tpu.dot_dimension_numbers<[1], [0], [0], [1], [0, 0, 1, 1], [], []>} : vector<4x4xf32>, vector<4x256xf32>, vector<4x256xf32> -> vector<4x256xf32>
    %144 = arith.addf %139, %143 : vector<4x256xf32>
    %c0_97 = arith.constant 0 : index
    %c129_98 = arith.constant 129 : index
    %145 = vector.load %arg7[%c0_97, %c129_98] : memref<4x512xf32, #tpu.memory_space<vmem>>, vector<4x256xf32>
    %cst_99 = arith.constant 0.000000e+00 : f32
    %146 = vector.shape_cast %20 : vector<1x256xi1> to vector<1x256xi1>
    %147 = vector.broadcast %146 : vector<1x256xi1> to vector<4x256xi1>
    %148 = vector.broadcast %cst_99 : f32 to vector<4x256xf32>
    %149 = arith.select %147, %145, %148 : vector<4x256xi1>, vector<4x256xf32>
    %c5_100 = arith.constant 5 : index
    %c0_101 = arith.constant 0 : index
    %c0_102 = arith.constant 0 : index
    %150 = vector.load %arg4[%c5_100, %c0_101, %c0_102] : memref<9x4x4xf32, #tpu.memory_space<vmem>>, vector<1x4x4xf32>
    %151 = vector.shape_cast %150 : vector<1x4x4xf32> to vector<4x4xf32>
    %cst_103 = arith.constant dense<0.000000e+00> : vector<4x256xf32>
    %152 = tpu.matmul %151, %149, %cst_103 {dimension_numbers = #tpu.dot_dimension_numbers<[1], [0], [0], [1], [0, 0, 1, 1], [], []>} : vector<4x4xf32>, vector<4x256xf32>, vector<4x256xf32> -> vector<4x256xf32>
    %153 = arith.addf %144, %152 : vector<4x256xf32>
    %c0_104 = arith.constant 0 : index
    %c143_105 = arith.constant 143 : index
    %154 = vector.load %arg7[%c0_104, %c143_105] : memref<4x512xf32, #tpu.memory_space<vmem>>, vector<4x256xf32>
    %cst_106 = arith.constant 0.000000e+00 : f32
    %155 = vector.shape_cast %18 : vector<1x256xi1> to vector<1x256xi1>
    %156 = vector.broadcast %155 : vector<1x256xi1> to vector<4x256xi1>
    %157 = vector.broadcast %cst_106 : f32 to vector<4x256xf32>
    %158 = arith.select %156, %154, %157 : vector<4x256xi1>, vector<4x256xf32>
    %c6_107 = arith.constant 6 : index
    %c0_108 = arith.constant 0 : index
    %c0_109 = arith.constant 0 : index
    %159 = vector.load %arg4[%c6_107, %c0_108, %c0_109] : memref<9x4x4xf32, #tpu.memory_space<vmem>>, vector<1x4x4xf32>
    %160 = vector.shape_cast %159 : vector<1x4x4xf32> to vector<4x4xf32>
    %cst_110 = arith.constant dense<0.000000e+00> : vector<4x256xf32>
    %161 = tpu.matmul %160, %158, %cst_110 {dimension_numbers = #tpu.dot_dimension_numbers<[1], [0], [0], [1], [0, 0, 1, 1], [], []>} : vector<4x4xf32>, vector<4x256xf32>, vector<4x256xf32> -> vector<4x256xf32>
    %162 = arith.addf %153, %161 : vector<4x256xf32>
    %c0_111 = arith.constant 0 : index
    %c144_112 = arith.constant 144 : index
    %163 = vector.load %arg7[%c0_111, %c144_112] : memref<4x512xf32, #tpu.memory_space<vmem>>, vector<4x256xf32>
    %c7_113 = arith.constant 7 : index
    %c0_114 = arith.constant 0 : index
    %c0_115 = arith.constant 0 : index
    %164 = vector.load %arg4[%c7_113, %c0_114, %c0_115] : memref<9x4x4xf32, #tpu.memory_space<vmem>>, vector<1x4x4xf32>
    %165 = vector.shape_cast %164 : vector<1x4x4xf32> to vector<4x4xf32>
    %cst_116 = arith.constant dense<0.000000e+00> : vector<4x256xf32>
    %166 = tpu.matmul %165, %163, %cst_116 {dimension_numbers = #tpu.dot_dimension_numbers<[1], [0], [0], [1], [0, 0, 1, 1], [], []>} : vector<4x4xf32>, vector<4x256xf32>, vector<4x256xf32> -> vector<4x256xf32>
    %167 = arith.addf %162, %166 : vector<4x256xf32>
    %c0_117 = arith.constant 0 : index
    %c145_118 = arith.constant 145 : index
    %168 = vector.load %arg7[%c0_117, %c145_118] : memref<4x512xf32, #tpu.memory_space<vmem>>, vector<4x256xf32>
    %cst_119 = arith.constant 0.000000e+00 : f32
    %169 = vector.shape_cast %20 : vector<1x256xi1> to vector<1x256xi1>
    %170 = vector.broadcast %169 : vector<1x256xi1> to vector<4x256xi1>
    %171 = vector.broadcast %cst_119 : f32 to vector<4x256xf32>
    %172 = arith.select %170, %168, %171 : vector<4x256xi1>, vector<4x256xf32>
    %c8_120 = arith.constant 8 : index
    %c0_121 = arith.constant 0 : index
    %c0_122 = arith.constant 0 : index
    %173 = vector.load %arg4[%c8_120, %c0_121, %c0_122] : memref<9x4x4xf32, #tpu.memory_space<vmem>>, vector<1x4x4xf32>
    %174 = vector.shape_cast %173 : vector<1x4x4xf32> to vector<4x4xf32>
    %cst_123 = arith.constant dense<0.000000e+00> : vector<4x256xf32>
    %175 = tpu.matmul %174, %172, %cst_123 {dimension_numbers = #tpu.dot_dimension_numbers<[1], [0], [0], [1], [0, 0, 1, 1], [], []>} : vector<4x4xf32>, vector<4x256xf32>, vector<4x256xf32> -> vector<4x256xf32>
    %176 = arith.addf %167, %175 : vector<4x256xf32>
    %c0_124 = arith.constant 0 : index
    %c0_125 = arith.constant 0 : index
    %c0_126 = arith.constant 0 : index
    %177 = vector.load %arg5[%c0_124, %c0_125, %c0_126] : memref<2x4x1xf32, #tpu.memory_space<vmem>>, vector<1x4x1xf32>
    %178 = vector.shape_cast %177 : vector<1x4x1xf32> to vector<4x1xf32>
    %179 = vector.broadcast %178 : vector<4x1xf32> to vector<4x256xf32>
    %180 = arith.mulf %176, %179 : vector<4x256xf32>
    %c1_127 = arith.constant 1 : index
    %c0_128 = arith.constant 0 : index
    %c0_129 = arith.constant 0 : index
    %181 = vector.load %arg5[%c1_127, %c0_128, %c0_129] : memref<2x4x1xf32, #tpu.memory_space<vmem>>, vector<1x4x1xf32>
    %182 = vector.shape_cast %181 : vector<1x4x1xf32> to vector<4x1xf32>
    %183 = vector.broadcast %182 : vector<4x1xf32> to vector<4x256xf32>
    %184 = arith.addf %180, %183 : vector<4x256xf32>
    %185 = arith.addf %184, %22 : vector<4x256xf32>
    %cst_130 = arith.constant 0.000000e+00 : f32
    %186 = vector.broadcast %cst_130 : f32 to vector<4x256xf32>
    %187 = arith.maximumf %185, %186 : vector<4x256xf32>
    %c0_131 = arith.constant 0 : index
    %c0_132 = arith.constant 0 : index
    %c0_133 = arith.constant 0 : index
    %188 = vector.load %arg6[%c0_131, %c0_132, %c0_133] : memref<1x4x256xf32, #tpu.memory_space<vmem>>, vector<1x4x256xf32>
    %189 = vector.shape_cast %188 : vector<1x4x256xf32> to vector<4x256xf32>
    %190 = vector.shape_cast %187 : vector<4x256xf32> to vector<1x4x256xf32>
    tpu.vector_store %arg6[%c0_131, %c0_132, %c0_133], %190 {strides = array<i32>} : memref<1x4x256xf32, #tpu.memory_space<vmem>>, vector<1x4x256xf32>,
    return
  }
  func.func @transform_0(%arg0: i32) -> (i32, i32, i32) {
    %c0_i32 = arith.constant 0 : i32
    %c0_i32_0 = arith.constant 0 : i32
    %c0_i32_1 = arith.constant 0 : i32
    return %arg0, %c0_i32, %c0_i32_0 : i32, i32, i32
  }
  func.func @transform_1(%arg0: i32) -> (i32, i32, i32) {
    %c0_i32 = arith.constant 0 : i32
    %c0_i32_0 = arith.constant 0 : i32
    %c0_i32_1 = arith.constant 0 : i32
    %c0_i32_2 = arith.constant 0 : i32
    return %c0_i32, %c0_i32_0, %c0_i32_1 : i32, i32, i32
  }
  func.func @transform_2(%arg0: i32) -> (i32, i32, i32) {
    %c0_i32 = arith.constant 0 : i32
    %c0_i32_0 = arith.constant 0 : i32
    %c0_i32_1 = arith.constant 0 : i32
    %c0_i32_2 = arith.constant 0 : i32
    return %c0_i32, %c0_i32_0, %c0_i32_1 : i32, i32, i32
  }
  func.func @transform_3(%arg0: i32) -> (i32, i32, i32) {
    %c0_i32 = arith.constant 0 : i32
    %c0_i32_0 = arith.constant 0 : i32
    %c0_i32_1 = arith.constant 0 : i32
    %c0_i32_2 = arith.constant 0 : i32
    return %c0_i32, %c0_i32_0, %c0_i32_1 : i32, i32, i32
  }
  func.func @transform_4(%arg0: i32) -> (i32, i32, i32) {
    %c0_i32 = arith.constant 0 : i32
    %c0_i32_0 = arith.constant 0 : i32
    %c0_i32_1 = arith.constant 0 : i32
    %c0_i32_2 = arith.constant 0 : i32
    return %c0_i32, %c0_i32_0, %c0_i32_1 : i32, i32, i32
  }
  func.func @transform_5(%arg0: i32) -> (i32, i32, i32) {
    %c0_i32 = arith.constant 0 : i32
    %c0_i32_0 = arith.constant 0 : i32
    %c0_i32_1 = arith.constant 0 : i32
    return %arg0, %c0_i32, %c0_i32_0 : i32, i32, i32
  }
}

</mosaic_0001>

<bundles_post_ra>
// kernel: tpu_custom_call.1
= control target key start
LH: loop header
LB: loop body
LE: loop exit
PB: predicated region body
PF: predicated region fallthrough
CT: control target
= control target key end

     0   :  { %10 = vsyncpa [#allocation4], 0  ;;  %s2345_s0 = inlined_call_operand.vmem [shape: f32[2,4,256], index: 0, kind: input, shape index: {}]   ;;  %s2346_s1 = inlined_call_operand.vmem [shape: f32[9,4,4], index: 1, kind: input, shape index: {}]   ;;  %s2347_s2 = inlined_call_operand.vmem [shape: f32[2,4,1], index: 2, kind: input, shape index: {}]   ;;  %s2348_s3 = inlined_call_operand.vmem [shape: f32[9,4,4], index: 3, kind: input, shape index: {}]   ;;  %s2349_s4 = inlined_call_operand.vmem [shape: f32[2,4,1], index: 4, kind: input, shape index: {}]   ;;  %s2350_s5 = inlined_call_operand.hbm [shape: f32[2,4,256], index: 5, kind: output, shape index: {}]  }
   0x1   :  { %12 = vsyncpa [#allocation4 + $0x1], 0  ;;  %s1947_s18 = smov 0   ;;  %s1949_s19 = smov 0  }
   0x2   :  { %s1951_s20 = smov 0   ;;  %s1953_s21 = smov 0  }
   0x3 LB: > { %s1968_s22 = sadd.s32 4294967295, %s1905_s21   ;;  %s1688_s23 = sadd.s32 4294967294, %s1905_s21   ;;  %s1905_s21 = sphi %s1953_s21, %s2364_s21   ;;  %s1901_s20 = sphi %s1951_s20, %s2363_s20   ;;  %s1897_s19 = sphi %s1949_s19, %s2362_s19   ;;  %s1893_s18 = sphi %s1947_s18, %s2361_s18  }
   0x4   : > { %s1972_s24 = sadd.s32 1, %s1905_s21   ;;  %s135_s25 = sadd.s32 1, %s1901_s20 }
   0x5   : > { %s132_s26 = ssub.s32 %s1905_s21, %s1972_s24  ;;  %p145_p0 = scmp.ne.s32.totalorder %s1901_s20, %s1897_s19 }
   0x6   : > { %p133_p1 = scmp.eq.s32.totalorder %s132_s26, 0  ;;  %p146_p2 = scmp.eq.s32.totalorder %s1968_s22, 1 }
   0x7   : > { %p151_p3 = scmp.ne.s32.totalorder %s1897_s19, %s1893_s18  ;;  %p152_p4 = scmp.eq.s32.totalorder %s1688_s23, 1 }
   0x8   : > { %s1983_s27 = scalar_select %p133_p1, %s1901_s20, %s135_s25  }
   0x9   : > { %p1985_p5 = por %p146_p2, %p145_p0  ;;  %p1989_p6 = por %p152_p4, %p151_p3 }
   0xa   : > { %p1691_p7 = scmp.ge.s32.totalorder %s1905_s21, 1  ;;  %p190_p8 = scmp.lt.s32.totalorder %s1905_s21, 3 }
   0xc   : > { %p191_p9 = pnand %p1691_p7, %p190_p8 }
   0xd   : > { %p218_p10 = scmp.lt.s32.totalorder (!%p191_p9), %s1968_s22, 1  ;;  %s1908_s10 = smov (!%p191_p9), 17  }
   0xe   : > { %194 = sbr.rel (%p191_p9) target bundleno = 708 (0x2c4), region = 40  ;;  %s1909_s11 = smov (!%p191_p9), 16  }
   0xf   : > { %s1910_s12 = smov (!%p191_p9), 15   ;;  %s1911_s13 = smov (!%p191_p9), 1  }
  0x10   : > { %s1912_s14 = smov (!%p191_p9), 127   ;;  %s1913_s15 = smov (!%p191_p9), 113  }
  0x11   : > { %s1914_s16 = smov (!%p191_p9), 112   ;;  %s1915_s17 = smov (!%p191_p9), 111  }
  0x12   : > { %s1791_s8 = sshll.u32 (!%p191_p9), %s1968_s22, 3 }
  0x13   : > { %v1907_v0 = vmov 0.0   ;;  %s219_s30 = scalar_select %p218_p10, %s1968_s22, 1  ;;  %v223_v38 = vlaneseq  ;;  %vm278_vm0 = vcmask 138240   ;;  %vm311_vm2 = vcmask 1043456   ;;  %v285_v49 = vld [vmem:[%s2346_s1] sm:$0xf] }
  0x14   : > { %255 = vst [vmem:[#allocation2] sm:$0xff] %v1907_v0  ;;  %vm307_vm3 = vcmask 31744   ;;  %vm304_vm4 = vcmask 130048   ;;  %vm501_vm6 = vcmask 7168   ;;  %v1695_v57 = vld [vmem:[%s2346_s1 + $0x4] sm:$0xf]  ;;  %s1624_s25 = scalar_lea.hbm %s2350_s5, %s1791_s8 }
  0x15   : > { %256 = vst [vmem:[#allocation2 + $0x8] sm:$0xff] %v1907_v0  ;;  %s1790_s6 = sshll.u32 %s219_s30, 3  ;;  %v224_v40 = vand.u32 127, %v223_v38  ;;  %v1709_v60 = vld [vmem:[%s2346_s1 + $0xc] sm:$0xf]  ;;  %vm425_vm7 = vcmask 121856  }
  0x16   : > { %s222_s9 = scalar_lea.vmem %s2345_s0, %s1790_s6  ;;  %vm633_vm10 = vcmask 1039360   ;;  %vm787_vm11 = vcmask 916480   ;;  %vm709_vm12 = vcmask 924672   ;;  %vm855_vm13 = vcmask 908288   ;;  %v1779_v42 = vld [vmem:[%s2348_s3 + $0x20] sm:$0xf] }
  0x17   : > { %v2000_v1 = vld [vmem:[%s222_s9] sm:$0xff]  ;;  %v230_v41 = vand.u32 15, %v224_v40  ;;  %v225_v43 = vadd.s32 128, %v224_v40  ;;  %s1628_s6 = sshll.u32 %s1624_s25, 4  ;;  %s1629_s6 = int_to_ptr.hbm [resolvable:$true] %s1628_s6 }
  0x18   : > { %257 = vst [vmem:[#allocation2 + $0x4] sm:$0xff] %v2000_v1  ;;  %s1857_s7 = sshra.s32 %s1629_s6, 4  ;;  %s1858_s7 = int_to_ptr.hbm [resolvable:$true] %s1857_s7 }
  0x19   : > { %vm2036_vm1 = vcmp.gt.s32.totalorder %v230_v41, 0  ;;  %v237_v48 = vand.u32 15, %v225_v43  ;;  %vm2093_vm9 = vcmp.lt.s32.totalorder %v230_v41, 15  ;;  %p1864_p0 = scmp.lt.s32.totalorder %s1858_s7, %s2350_s5 }
  0x1b   : > { %vm2048_vm5 = vcmp.gt.s32.totalorder %v237_v48, 0  ;;  %vm2074_vm8 = vcmp.lt.s32.totalorder %v237_v48, 15 }
  0x1c   : > { %v618_v16 = vld [vmem:[#allocation2 + $0xc] sm:$0xf] }
  0x1d   : > { %v694_v20 = vld [vmem:[#allocation2 + $0xc] sm:$0xf] }
  0x1e   : > { %v770_v24 = vld [vmem:[#allocation2 + $0xc] sm:$0xf] }
  0x1f   : > { %v258_v2 = vld [vmem:[#allocation2] sm:$0xff]  ;;  %v259_v3 = vld [vmem:[#allocation2 + $0x8] sm:$0xf]  ;;  %v840_v28 = vld [vmem:[#allocation2 + $0xc] sm:$0xf] }
  0x20   : > { %266 = vst [vmem:[#allocation1] ss:$2 sm:$0xff] %v258_v2  ;;  %v287_v4 = vld [vmem:[#allocation2 + $0x8] sm:$0xf] }
  0x21   : > { %268 = vst [vmem:[#allocation1 + $0x10] ss:$2 sm:$0xff] %v259_v3  ;;  %v406_v8 = vld [vmem:[#allocation2 + $0x8] sm:$0xf] }
  0x22   : > { %v486_v12 = vld [vmem:[#allocation2 + $0x8] sm:$0xf] }
  0x27   : > { %v270_v5 = vld.sshfl [vmem:[#allocation1 + $0x8] sm:$0xff pattern:$0x75316420]  ;;  %v269_v6 = vld.sshfl [vmem:[#allocation1] sm:$0xff pattern:$0x75316420] }
  0x28   : > { %274 = vrot.lane.b32.xlu0 %v270_v5, %s1908_s10  ;;  %v271_v7 = vld.sshfl [vmem:[#allocation1 + $0x10] sm:$0xff pattern:$0x75316420]  ;;  %292 = vst [vmem:[#allocation1] ss:$2 sm:$0xff] %v258_v2  ;;  %272 = vrot.lane.b32.xlu2 %v269_v6, %s1908_s10 }
  0x29   : > { %294 = vst [vmem:[#allocation1 + $0x10] ss:$2 sm:$0xff] %v287_v4  ;;  %v1704_v6 = vld [vmem:[%s2346_s1 + $0x8] sm:$0xf] }
  0x2f   : > { %v296_v9 = vld.sshfl [vmem:[#allocation1 + $0x8] sm:$0xff pattern:$0x75316420]  ;;  %v295_v10 = vld.sshfl [vmem:[#allocation1] sm:$0xff pattern:$0x75316420] }
  0x30   : > { %276 = vrot.lane.b32.xlu0 %v271_v7, %s1908_s10  ;;  %300 = vrot.lane.b32.xlu1 %v296_v9, %s1909_s11  ;;  %v297_v11 = vld.sshfl [vmem:[#allocation1 + $0x10] sm:$0xff pattern:$0x75316420]  ;;  %413 = vst [vmem:[#allocation1] ss:$2 sm:$0xff] %v258_v2 }
  0x31   : > { %415 = vst [vmem:[#allocation1 + $0x10] ss:$2 sm:$0xff] %v406_v8  ;;  %298 = vrot.lane.b32.xlu2 %v295_v10, %s1909_s11 }
  0x37   : > { %v417_v13 = vld.sshfl [vmem:[#allocation1 + $0x8] sm:$0xff pattern:$0x75316420]  ;;  %v416_v14 = vld.sshfl [vmem:[#allocation1] sm:$0xff pattern:$0x75316420] }
  0x38   : > { %302 = vrot.lane.b32.xlu1 %v297_v11, %s1909_s11  ;;  %421 = vrot.lane.b32.xlu0 %v417_v13, %s1910_s12  ;;  %v418_v15 = vld.sshfl [vmem:[#allocation1 + $0x10] sm:$0xff pattern:$0x75316420]  ;;  %489 = vst [vmem:[#allocation1] ss:$2 sm:$0xff] %v258_v2 }
  0x39   : > { %491 = vst [vmem:[#allocation1 + $0x10] ss:$2 sm:$0xff] %v486_v12  ;;  %v1714_v13 = vld [vmem:[%s2346_s1 + $0x10] sm:$0xf] }
  0x3f   : > { %v492_v17 = vld.sshfl [vmem:[#allocation1] sm:$0xff pattern:$0x75316420]  ;;  %v493_v18 = vld.sshfl [vmem:[#allocation1 + $0x8] sm:$0xff pattern:$0x75316420] }
  0x40   : > { %423 = vrot.lane.b32.xlu1 %v418_v15, %s1910_s12  ;;  %v494_v19 = vld.sshfl [vmem:[#allocation1 + $0x10] sm:$0xff pattern:$0x75316420]  ;;  %565 = vst [vmem:[#allocation1] ss:$2 sm:$0xff] %v2000_v1  ;;  %497 = vrot.lane.b32.xlu2 %v493_v18, %s1911_s13  ;;  %v1916_v18 = vmov 0  }
  0x41   : > { %499 = vrot.lane.b32.xlu0 %v494_v19, %s1911_s13  ;;  %623 = vst [vmem:[#allocation1 + $0x10] ss:$2 sm:$0xff] %v618_v16  ;;  %v915_v16 = vld [vmem:[%s2347_s2] sm:$0xf]  ;;  %1842 = vset.pattern.permute.xlu1 %v1916_v18 }
  0x42   : > { %1841 = vset.pattern.permute.xlu0 %v1916_v18 }
  0x47   : > { %v2014_v21 = vld.sshfl [vmem:[#allocation1] sm:$0xff pattern:$0x75316420]  ;;  %v2016_v22 = vld.sshfl [vmem:[#allocation1 + $0x8] sm:$0xff pattern:$0x75316420] }
  0x48   : > { %419 = vrot.lane.b32.xlu1 %v416_v14, %s1910_s12  ;;  %v626_v23 = vld.sshfl [vmem:[#allocation1 + $0x10] sm:$0xff pattern:$0x75316420]  ;;  %621 = vst [vmem:[#allocation1] ss:$2 sm:$0xff] %v2000_v1  ;;  %495 = vrot.lane.b32.xlu2 %v492_v17, %s1911_s13 }
  0x49   : > { %699 = vst [vmem:[#allocation1 + $0x10] ss:$2 sm:$0xff] %v694_v20  ;;  %v1739_v17 = vld [vmem:[%s2347_s2 + $0x4] sm:$0xf] }
  0x4f   : > { %v625_v25 = vld.sshfl [vmem:[#allocation1 + $0x8] sm:$0xff pattern:$0x75316420]  ;;  %v624_v26 = vld.sshfl [vmem:[#allocation1] sm:$0xff pattern:$0x75316420] }
  0x50   : > { %631 = vrot.lane.b32.xlu1 %v626_v23, %s1912_s14  ;;  %629 = vrot.lane.b32.xlu0 %v625_v25, %s1912_s14  ;;  %v702_v27 = vld.sshfl [vmem:[#allocation1 + $0x10] sm:$0xff pattern:$0x75316420]  ;;  %697 = vst [vmem:[#allocation1] ss:$2 sm:$0xff] %v2000_v1 }
  0x51   : > { %777 = vst [vmem:[#allocation1 + $0x10] ss:$2 sm:$0xff] %v770_v24  ;;  %627 = vrot.lane.b32.xlu2 %v624_v26, %s1912_s14  ;;  %v1719_v24 = vld [vmem:[%s2346_s1 + $0x14] sm:$0xf] }
  0x57   : > { %v701_v29 = vld.sshfl [vmem:[#allocation1 + $0x8] sm:$0xff pattern:$0x75316420]  ;;  %v700_v30 = vld.sshfl [vmem:[#allocation1] sm:$0xff pattern:$0x75316420] }
  0x58   : > { %707 = vrot.lane.b32.xlu1 %v702_v27, %s1913_s15  ;;  %705 = vrot.lane.b32.xlu0 %v701_v29, %s1913_s15  ;;  %v780_v31 = vld.sshfl [vmem:[#allocation1 + $0x10] sm:$0xff pattern:$0x75316420]  ;;  %775 = vst [vmem:[#allocation1] ss:$2 sm:$0xff] %v2000_v1 }
  0x59   : > { %845 = vst [vmem:[#allocation1 + $0x10] ss:$2 sm:$0xff] %v840_v28 }
  0x5f   : > { %v778_v32 = vld.sshfl [vmem:[#allocation1] sm:$0xff pattern:$0x75316420]  ;;  %v779_v33 = vld.sshfl [vmem:[#allocation1 + $0x8] sm:$0xff pattern:$0x75316420] }
  0x60   : > { %785 = vrot.lane.b32.xlu0 %v780_v31, %s1914_s16  ;;  %703 = vrot.lane.b32.xlu1 %v700_v30, %s1913_s15  ;;  %843 = vst [vmem:[#allocation1] ss:$2 sm:$0xff] %v2000_v1  ;;  %v848_v34 = vld.sshfl [vmem:[#allocation1 + $0x10] sm:$0xff pattern:$0x75316420] }
  0x61   : > { %783 = vrot.lane.b32.xlu2 %v779_v33, %s1914_s16  ;;  %v1724_v31 = vld [vmem:[%s2346_s1 + $0x18] sm:$0xf] }
  0x67   : > { %v847_v35 = vld.sshfl [vmem:[#allocation1 + $0x8] sm:$0xff pattern:$0x75316420]  ;;  %v846_v36 = vld.sshfl [vmem:[#allocation1] sm:$0xff pattern:$0x75316420] }
  0x68   : > { %853 = vrot.lane.b32.xlu1 %v848_v34, %s1915_s17  ;;  %851 = vrot.lane.b32.xlu0 %v847_v35, %s1915_s17 }
  0x69   : > { %781 = vrot.lane.b32.xlu2 %v778_v32, %s1914_s16  ;;  %v1729_v32 = vld [vmem:[%s2346_s1 + $0x1c] sm:$0xf] }
  0x70   : > { %918 = vperm.xlu0 %1841, %v915_v16   ;;  %927 = vperm.xlu1 %1842, %v1739_v17  }
  0x71   : > { %849 = vrot.lane.b32.xlu2 %v846_v36, %s1915_s17 }
  0x82   : > { %v273_v37 = vpop.permute.xlu2 %272 }
  0x8b   : > { %v299_v39 = vpop.permute.xlu2 %298 }
  0x9a   : > { %v275_v44 = vpop.permute.xlu0 %274  ;;  %v498_v45 = vpop.permute.xlu2 %497 }
  0x9b   : > { %v279_v46 = vsel %vm278_vm0, %v273_v37, %v275_v44 }
  0x9c   : > { %v283_v47 = vsel %vm2036_vm1, %v279_v46, 0.0 }
  0x9d   : > { %1700 = vmatpush.msk.msra.mxu2 %vm311_vm2, %v283_v47 }
  0x9e   : > { %1701 = vmatmul.msk.f32.vlgmr.msra.gmra.mxu2 %vm307_vm3, %v285_v49 }
  0xa2   : > { %v277_v51 = vpop.permute.xlu0 %276  ;;  %v301_v52 = vpop.permute.xlu1 %300 }
  0xa3   : > { %v305_v53 = vsel %vm304_vm4, %v299_v39, %v301_v52  ;;  %v280_v54 = vsel %vm278_vm0, %v275_v44, %v277_v51  ;;  %v496_v55 = vpop.permute.xlu2 %495 }
  0xa4   : > { %1696 = vmatpush.msk.msra.mxu0 %vm311_vm2, %v305_v53  ;;  %v284_v56 = vsel %vm2048_vm5, %v280_v54, 0.0  ;;  %v502_v58 = vsel %vm501_vm6, %v496_v55, %v498_v45 }
  0xa5   : > { %1702 = vmatpush.msk.msra.mxu3 %vm311_vm2, %v284_v56  ;;  %1697 = vmatmul.msk.f32.vlgmr.msra.gmra.mxu0 %vm307_vm3, %v1695_v57  ;;  %v506_v59 = vsel %vm2036_vm1, %v502_v58, 0.0 }
  0xa6   : > { %1703 = vmatmul.msk.f32.vlgmr.msra.gmra.mxu3 %vm307_vm3, %v285_v49  ;;  %1710 = vmatpush.msk.msrb.mxu2 %vm311_vm2, %v506_v59 }
  0xa7   : > { %1711 = vmatmul.msk.f32.vlgmr.msrb.gmra.mxu2 %vm307_vm3, %v1709_v60 }
  0xaa   : > { %v303_v61 = vpop.permute.xlu1 %302  ;;  %v422_v62 = vpop.permute.xlu0 %421 }
  0xab   : > { %v306_v63 = vsel %vm304_vm4, %v301_v52, %v303_v61  ;;  %v628_v2 = vpop.permute.xlu2 %627 }
  0xac   : > { %1698 = vmatpush.msk.msra.mxu1 %vm311_vm2, %v306_v63 }
  0xad   : > { %1699 = vmatmul.msk.f32.vlgmr.msra.gmra.mxu1 %vm307_vm3, %v1695_v57 }
  0xb2   : > { %v424_v3 = vpop.permute.xlu1 %423 }
  0xb3   : > { %v427_v4 = vsel %vm425_vm7, %v422_v62, %v424_v3  ;;  %v500_v5 = vpop.permute.xlu0 %499 }
  0xb4   : > { %v503_v7 = vsel %vm501_vm6, %v498_v45, %v500_v5  ;;  %v431_v8 = vsel %vm2074_vm8, %v427_v4, 0.0  ;;  %v1734_v45 = vld [vmem:[%s2346_s1 + $0x20] sm:$0xf] }
  0xb5   : > { %1707 = vmatpush.msk.msrb.mxu1 %vm311_vm2, %v431_v8  ;;  %v507_v9 = vsel %vm2048_vm5, %v503_v7, 0.0 }
  0xb6   : > { %1712 = vmatpush.msk.msrb.mxu3 %vm311_vm2, %v507_v9  ;;  %1708 = vmatmul.msk.f32.vlgmr.msrb.gmra.mxu1 %vm307_vm3, %v1704_v6 }
  0xb7   : > { %1713 = vmatmul.msk.f32.vlgmr.msrb.gmra.mxu3 %vm307_vm3, %v1709_v60  ;;  %1717 = vmatpush.msk.msra.mxu1 %vm311_vm2, %v2016_v22 }
  0xba   : > { %v420_v11 = vpop.permute.xlu1 %419 }
  0xbb   : > { %v426_v12 = vsel %vm425_vm7, %v420_v11, %v422_v62  ;;  %v784_v14 = vpop.permute.xlu2 %783 }
  0xbc   : > { %v430_v15 = vsel %vm2093_vm9, %v426_v12, 0.0 }
  0xbd   : > { %1705 = vmatpush.msk.msrb.mxu0 %vm311_vm2, %v430_v15 }
  0xbe   : > { %1706 = vmatmul.msk.f32.vlgmr.msrb.gmra.mxu0 %vm307_vm3, %v1704_v6  ;;  %1718 = vmatmul.msk.f32.vlgmr.msra.gmra.mxu1 %vm307_vm3, %v1714_v13 }
  0xbf   : > { %1715 = vmatpush.msk.msra.mxu0 %vm311_vm2, %v2014_v21 }
  0xc2   : > { %v632_v19 = vpop.permute.xlu1 %631  ;;  %v630_v20 = vpop.permute.xlu0 %629 }
  0xc3   : > { %v634_v22 = vsel %vm633_vm10, %v628_v2, %v630_v20  ;;  %v635_v23 = vsel %vm633_vm10, %v630_v20, %v632_v19  ;;  %v782_v25 = vpop.permute.xlu2 %781 }
  0xc4   : > { %v638_v21 = vsel %vm2093_vm9, %v634_v22, 0.0  ;;  %v639_v26 = vsel %vm2074_vm8, %v635_v23, 0.0  ;;  %v788_v27 = vsel %vm787_vm11, %v782_v25, %v784_v14 }
  0xc5   : > { %1720 = vmatpush.msk.msra.mxu2 %vm311_vm2, %v638_v21  ;;  %1722 = vmatpush.msk.msra.mxu3 %vm311_vm2, %v639_v26 }
  0xc6   : > { %1716 = vmatmul.msk.f32.vlgmr.msra.gmra.mxu0 %vm307_vm3, %v1714_v13  ;;  %1721 = vmatmul.msk.f32.vlgmr.msra.gmra.mxu2 %vm307_vm3, %v1719_v24 }
  0xc7   : > { %1723 = vmatmul.msk.f32.vlgmr.msra.gmra.mxu3 %vm307_vm3, %v1719_v24  ;;  %1730 = vmatpush.msk.msrb.mxu2 %vm311_vm2, %v788_v27 }
  0xca   : > { %v708_v28 = vpop.permute.xlu1 %707  ;;  %v706_v29 = vpop.permute.xlu0 %705 }
  0xcb   : > { %v711_v30 = vsel %vm709_vm12, %v706_v29, %v708_v28  ;;  %v850_v39 = vpop.permute.xlu2 %849 }
  0xcc   : > { %v715_v33 = vsel %vm2048_vm5, %v711_v30, 0.0 }
  0xcd   : > { %1727 = vmatpush.msk.msrb.mxu1 %vm311_vm2, %v715_v33 }
  0xce   : > { %1728 = vmatmul.msk.f32.vlgmr.msrb.gmra.mxu1 %vm307_vm3, %v1724_v31  ;;  %1731 = vmatmul.msk.f32.vlgmr.msrb.gmra.mxu2 %vm307_vm3, %v1729_v32 }
  0xd2   : > { %v786_v34 = vpop.permute.xlu0 %785  ;;  %v704_v35 = vpop.permute.xlu1 %703 }
  0xd3   : > { %v789_v36 = vsel %vm787_vm11, %v784_v14, %v786_v34  ;;  %v710_v37 = vsel %vm709_vm12, %v704_v35, %v706_v29 }
  0xd4   : > { %v714_v38 = vsel %vm2036_vm1, %v710_v37, 0.0  ;;  %1732 = vmatpush.msk.msrb.mxu3 %vm311_vm2, %v789_v36 }
  0xd5   : > { %1725 = vmatpush.msk.msrb.mxu0 %vm311_vm2, %v714_v38  ;;  %1733 = vmatmul.msk.f32.vlgmr.msrb.gmra.mxu3 %vm307_vm3, %v1729_v32 }
  0xd6   : > { %1726 = vmatmul.msk.f32.vlgmr.msrb.gmra.mxu0 %vm307_vm3, %v1724_v31 }
  0xda   : > { %v854_v40 = vpop.permute.xlu1 %853  ;;  %v852_v41 = vpop.permute.xlu0 %851 }
  0xdb   : > { %v857_v43 = vsel %vm855_vm13, %v852_v41, %v854_v40  ;;  %v856_v44 = vsel %vm855_vm13, %v850_v39, %v852_v41 }
  0xdc   : > { %v861_v46 = vsel %vm2074_vm8, %v857_v43, 0.0  ;;  %v860_v47 = vsel %vm2093_vm9, %v856_v44, 0.0 }
  0xdd   : > { %1735 = vmatpush.msk.msra.mxu0 %vm311_vm2, %v860_v47  ;;  %1737 = vmatpush.msk.msra.mxu1 %vm311_vm2, %v861_v46  ;;  %v1286_v47 = vld [vmem:[#allocation2 + $0xc] sm:$0xf] }
  0xde   : > { %1736 = vmatmul.msk.f32.vlgmr.msra.gmra.mxu0 %vm307_vm3, %v1734_v45  ;;  %1738 = vmatmul.msk.f32.vlgmr.msra.gmra.mxu1 %vm307_vm3, %v1734_v45 }
  0xe2   : > { %v919_v18 = vpop.permute.xlu0 %918  ;;  %v928_v24 = vpop.permute.xlu1 %927 }
 0x121   : > { %v382_v51 = vpop.f32.mrf.mxu2 }
 0x122   : > { %v333_v49 = vpop.f32.mrf.mxu0 }
 0x123   : > { %v383_v57 = vadd.f32 %v382_v51, %v333_v49 }
 0x129   : > { %v402_v52 = vpop.f32.mrf.mxu3 }
 0x12a   : > { %v353_v48 = vpop.f32.mrf.mxu1  ;;  %v536_v56 = vpop.f32.mrf.mxu2 }
 0x12b   : > { %v403_v55 = vadd.f32 %v402_v52, %v353_v48  ;;  %v1361_v52 = vld [vmem:[#allocation2 + $0xc] sm:$0xf] }
 0x133   : > { %v480_v53 = vpop.f32.mrf.mxu1 }
 0x134   : > { %v484_v59 = vadd.f32 %v480_v53, %v403_v55 }
 0x13a   : > { %v556_v58 = vpop.f32.mrf.mxu3 }
 0x13b   : > { %v460_v54 = vpop.f32.mrf.mxu0  ;;  %v612_v61 = vpop.f32.mrf.mxu1  ;;  %v560_v63 = vadd.f32 %v556_v58, %v484_v59 }
 0x13c   : > { %v483_v60 = vadd.f32 %v460_v54, %v383_v57 }
 0x13d   : > { %v616_v5 = vadd.f32 %v612_v61, %v560_v63 }
 0x13e   : > { %v559_v2 = vadd.f32 %v536_v56, %v483_v60  ;;  %v1436_v56 = vld [vmem:[#allocation2 + $0xc] sm:$0xf] }
 0x13f   : > { %v1505_v60 = vld [vmem:[#allocation2 + $0xc] sm:$0xf] }
 0x143   : > { %v592_v62 = vpop.f32.mrf.mxu0 }
 0x144   : > { %v615_v6 = vadd.f32 %v592_v62, %v559_v2 }
 0x149   : > { %v668_v3 = vpop.f32.mrf.mxu2 }
 0x14a   : > { %v688_v4 = vpop.f32.mrf.mxu3  ;;  %v691_v11 = vadd.f32 %v668_v3, %v615_v6 }
 0x14b   : > { %v692_v7 = vadd.f32 %v688_v4, %v616_v5  ;;  %v764_v8 = vpop.f32.mrf.mxu1 }
 0x14d   : > { %v768_v13 = vadd.f32 %v764_v8, %v692_v7  ;;  %v1784_v7 = vld [vmem:[%s2349_s4 + $0x4] sm:$0xf]  ;;  %v1579_v8 = vld [vmem:[%s2349_s4] sm:$0xf] }
 0x151   : > { %v814_v14 = vpop.f32.mrf.mxu2 }
 0x153   : > { %v744_v9 = vpop.f32.mrf.mxu0 }
 0x154   : > { %v767_v12 = vadd.f32 %v744_v9, %v691_v11 }
 0x156   : > { %v837_v17 = vadd.f32 %v814_v14, %v767_v12 }
 0x158   : > { %v834_v15 = vpop.f32.mrf.mxu3 }
 0x159   : > { %v838_v16 = vadd.f32 %v834_v15, %v768_v13 }
 0x15b   : > { %v890_v19 = vpop.f32.mrf.mxu0  ;;  %v910_v20 = vpop.f32.mrf.mxu1 }
 0x15c   : > { %v913_v22 = vadd.f32 %v890_v19, %v837_v17  ;;  %v914_v23 = vadd.f32 %v910_v20, %v838_v16  ;;  %v962_v20 = vld [vmem:[%s2348_s3] sm:$0xf] }
 0x15e   : > { %v921_v25 = vmul.f32 %v919_v18, %v913_v22  ;;  %v922_v21 = vmul.f32 %v919_v18, %v914_v23 }
 0x160   : > { %v930_v26 = vadd.f32 %v928_v24, %v921_v25  ;;  %v931_v27 = vadd.f32 %v928_v24, %v922_v21 }
 0x162   : > { %v933_v28 = vmax.f32 %v931_v27, 0.0  ;;  %v932_v29 = vmax.f32 %v930_v26, 0.0 }
 0x164   : > { %v936_v30 = vrot.slane %v933_v28, 4 }
 0x166   : > { %v2164_v31 = vsel %vm311_vm2, %v932_v29, %v936_v30  ;;  %v1749_v29 = vld [vmem:[%s2348_s3 + $0x8] sm:$0xf] }
 0x167   : > { %939 = vst [vmem:[#allocation2 + $0x4] sm:$0xff] %v2164_v31 }
 0x16e   : > { %v940_v32 = vld [vmem:[#allocation2] sm:$0xff]  ;;  %v941_v33 = vld [vmem:[#allocation2 + $0x8] sm:$0xf] }
 0x16f   : > { %944 = vst [vmem:[#allocation1] ss:$2 sm:$0xff] %v940_v32  ;;  %v964_v34 = vld [vmem:[#allocation2 + $0x8] sm:$0xf] }
 0x170   : > { %946 = vst [vmem:[#allocation1 + $0x10] ss:$2 sm:$0xff] %v941_v33  ;;  %v1080_v38 = vld [vmem:[#allocation2 + $0x8] sm:$0xf] }
 0x171   : > { %v1155_v43 = vld [vmem:[#allocation2 + $0x8] sm:$0xf] }
 0x176   : > { %v948_v35 = vld.sshfl [vmem:[#allocation1 + $0x8] sm:$0xff pattern:$0x75316420]  ;;  %v947_v36 = vld.sshfl [vmem:[#allocation1] sm:$0xff pattern:$0x75316420] }
 0x177   : > { %v949_v37 = vld.sshfl [vmem:[#allocation1 + $0x10] sm:$0xff pattern:$0x75316420]  ;;  %952 = vrot.lane.b32.xlu0 %v948_v35, %s1908_s10  ;;  %950 = vrot.lane.b32.xlu2 %v947_v36, %s1908_s10  ;;  %969 = vst [vmem:[#allocation1] ss:$2 sm:$0xff] %v940_v32 }
 0x178   : > { %954 = vrot.lane.b32.xlu1 %v949_v37, %s1908_s10  ;;  %971 = vst [vmem:[#allocation1 + $0x10] ss:$2 sm:$0xff] %v964_v34  ;;  %v1759_v37 = vld [vmem:[%s2348_s3 + $0x10] sm:$0xf]  ;;  %s1859_s10 = scalar_lea.hbm %s1858_s7, 8 }
 0x179   : > { %p1860_p11 = scmp.ne.s32.totalorder %s1858_s7, %s1859_s10 }
 0x17b   : > { %p1861_p12 = pnand %p1860_p11, %p1985_p5 }
 0x17d   : > { %p1862_p13 = pneg %p1861_p12 }
 0x17e   : > { %v973_v39 = vld.sshfl [vmem:[#allocation1 + $0x8] sm:$0xff pattern:$0x75316420]  ;;  %v972_v40 = vld.sshfl [vmem:[#allocation1] sm:$0xff pattern:$0x75316420] }
 0x17f   : > { %v974_v41 = vld.sshfl [vmem:[#allocation1 + $0x10] sm:$0xff pattern:$0x75316420]  ;;  %977 = vrot.lane.b32.xlu2 %v973_v39, %s1909_s11  ;;  %1083 = vst [vmem:[#allocation1] ss:$2 sm:$0xff] %v940_v32 }
 0x180   : > { %979 = vrot.lane.b32.xlu1 %v974_v41, %s1909_s11  ;;  %1085 = vst [vmem:[#allocation1 + $0x10] ss:$2 sm:$0xff] %v1080_v38  ;;  %v1754_v38 = vld [vmem:[%s2348_s3 + $0xc] sm:$0xf] }
 0x186   : > { %v1087_v44 = vld.sshfl [vmem:[#allocation1 + $0x8] sm:$0xff pattern:$0x75316420]  ;;  %v1086_v45 = vld.sshfl [vmem:[#allocation1] sm:$0xff pattern:$0x75316420] }
 0x187   : > { %v1088_v46 = vld.sshfl [vmem:[#allocation1 + $0x10] sm:$0xff pattern:$0x75316420]  ;;  %975 = vrot.lane.b32.xlu2 %v972_v40, %s1909_s11  ;;  %1091 = vrot.lane.b32.xlu0 %v1087_v44, %s1910_s12  ;;  %1158 = vst [vmem:[#allocation1] ss:$2 sm:$0xff] %v940_v32 }
 0x188   : > { %1093 = vrot.lane.b32.xlu1 %v1088_v46, %s1910_s12  ;;  %1160 = vst [vmem:[#allocation1 + $0x10] ss:$2 sm:$0xff] %v1155_v43  ;;  %v1764_v46 = vld [vmem:[%s2348_s3 + $0x14] sm:$0xf] }
 0x18e   : > { %v1162_v48 = vld.sshfl [vmem:[#allocation1 + $0x8] sm:$0xff pattern:$0x75316420]  ;;  %v1161_v49 = vld.sshfl [vmem:[#allocation1] sm:$0xff pattern:$0x75316420] }
 0x18f   : > { %v1163_v51 = vld.sshfl [vmem:[#allocation1 + $0x10] sm:$0xff pattern:$0x75316420]  ;;  %1089 = vrot.lane.b32.xlu2 %v1086_v45, %s1910_s12  ;;  %1166 = vrot.lane.b32.xlu0 %v1162_v48, %s1911_s13  ;;  %1233 = vst [vmem:[#allocation1] ss:$2 sm:$0xff] %v2164_v31 }
 0x190   : > { %1168 = vrot.lane.b32.xlu1 %v1163_v51, %s1911_s13  ;;  %1291 = vst [vmem:[#allocation1 + $0x10] ss:$2 sm:$0xff] %v1286_v47 }
 0x196   : > { %v2179_v53 = vld.sshfl [vmem:[#allocation1] sm:$0xff pattern:$0x75316420]  ;;  %v2181_v54 = vld.sshfl [vmem:[#allocation1 + $0x8] sm:$0xff pattern:$0x75316420] }
 0x197   : > { %1164 = vrot.lane.b32.xlu2 %v1161_v49, %s1911_s13  ;;  %1289 = vst [vmem:[#allocation1] ss:$2 sm:$0xff] %v2164_v31  ;;  %v1294_v55 = vld.sshfl [vmem:[#allocation1 + $0x10] sm:$0xff pattern:$0x75316420]  ;;  %s1863_s13 = scalar_lea.hbm %s2350_s5, 16 }
 0x198   : > { %1299 = vrot.lane.b32.xlu1 %v1294_v55, %s1912_s14  ;;  %1366 = vst [vmem:[#allocation1 + $0x10] ss:$2 sm:$0xff] %v1361_v52  ;;  %v1769_v55 = vld [vmem:[%s2348_s3 + $0x18] sm:$0xf]  ;;  %p1865_p1 = scmp.lt.s32.totalorder %s1863_s13, %s1859_s10 }
 0x19a   : > { %p1866_p2 = por %p1865_p1, %p1864_p0 }
 0x19c   : > { %p1867_p3 = pnand %p1866_p2, %p1862_p13 }
 0x19e   : > { %v1293_v57 = vld.sshfl [vmem:[#allocation1 + $0x8] sm:$0xff pattern:$0x75316420]  ;;  %v1292_v58 = vld.sshfl [vmem:[#allocation1] sm:$0xff pattern:$0x75316420] }
 0x19f   : > { %1297 = vrot.lane.b32.xlu0 %v1293_v57, %s1912_s14  ;;  %1295 = vrot.lane.b32.xlu2 %v1292_v58, %s1912_s14  ;;  %1364 = vst [vmem:[#allocation1] ss:$2 sm:$0xff] %v2164_v31  ;;  %v1369_v59 = vld.sshfl [vmem:[#allocation1 + $0x10] sm:$0xff pattern:$0x75316420] }
 0x1a0   : > { %1374 = vrot.lane.b32.xlu1 %v1369_v59, %s1913_s15  ;;  %1443 = vst [vmem:[#allocation1 + $0x10] ss:$2 sm:$0xff] %v1436_v56 }
 0x1a6   : > { %v1368_v61 = vld.sshfl [vmem:[#allocation1 + $0x8] sm:$0xff pattern:$0x75316420]  ;;  %v1367_v62 = vld.sshfl [vmem:[#allocation1] sm:$0xff pattern:$0x75316420] }
 0x1a7   : > { %v1446_v63 = vld.sshfl [vmem:[#allocation1 + $0x10] sm:$0xff pattern:$0x75316420]  ;;  %1372 = vrot.lane.b32.xlu0 %v1368_v61, %s1913_s15  ;;  %1370 = vrot.lane.b32.xlu2 %v1367_v62, %s1913_s15  ;;  %1441 = vst [vmem:[#allocation1] ss:$2 sm:$0xff] %v2164_v31 }
 0x1a8   : > { %1510 = vst [vmem:[#allocation1 + $0x10] ss:$2 sm:$0xff] %v1505_v60 }
 0x1ae   : > { %v1444_v2 = vld.sshfl [vmem:[#allocation1] sm:$0xff pattern:$0x75316420]  ;;  %v1445_v3 = vld.sshfl [vmem:[#allocation1 + $0x8] sm:$0xff pattern:$0x75316420] }
 0x1af   : > { %1508 = vst [vmem:[#allocation1] ss:$2 sm:$0xff] %v2164_v31  ;;  %v1513_v4 = vld.sshfl [vmem:[#allocation1 + $0x10] sm:$0xff pattern:$0x75316420] }
 0x1b0   : > { %1518 = vrot.lane.b32.xlu1 %v1513_v4, %s1915_s17 }
 0x1b6   : > { %v1512_v5 = vld.sshfl [vmem:[#allocation1 + $0x8] sm:$0xff pattern:$0x75316420]  ;;  %v1511_v6 = vld.sshfl [vmem:[#allocation1] sm:$0xff pattern:$0x75316420] }
 0x1b7   : > { %1516 = vrot.lane.b32.xlu0 %v1512_v5, %s1915_s17  ;;  %1514 = vrot.lane.b32.xlu2 %v1511_v6, %s1915_s17  ;;  %1597 = vst [vmem:[#allocation1] ss:$2 sm:$0xff] %v2000_v1  ;;  %v1740_v1 = vld [vmem:[%s2348_s3 + $0x4] sm:$0xf]  ;;  %v1774_v5 = vld [vmem:[%s2348_s3 + $0x1c] sm:$0xf] }
 0x1b8   : > { %1451 = vrot.lane.b32.xlu1 %v1446_v63, %s1914_s16 }
 0x1bf   : > { %1449 = vrot.lane.b32.xlu0 %v1445_v3, %s1914_s16  ;;  %1447 = vrot.lane.b32.xlu2 %v1444_v2, %s1914_s16  ;;  %s215_s16 = sand.u32 1, %s1897_s19  }
 0x1c0   : > { %1591 = vperm.xlu1 %1842, %v1784_v7   ;;  %s1692_s17 = sshll.u32 %s215_s16, 3  ;;  %s1613_s22 = scalar_lea.sflag [#allocation4], %s215_s16 }
 0x1c1   : > { %s217_s26 = scalar_lea.vmem [#allocation3], %s1692_s17 }
 0x1c2   : > { %s1626_s30 = sshll.u32 %s217_s26, 4  ;;  %s1627_s30 = int_to_ptr.vmem [resolvable:$true] %s1626_s30 }
 0x1c7   : > { %1582 = vperm.xlu0 %1841, %v1579_v8  }
 0x1d1   : > { %v951_v9 = vpop.permute.xlu2 %950 }
 0x1d9   : > { %v978_v11 = vpop.permute.xlu2 %977 }
 0x1e1   : > { %v976_v12 = vpop.permute.xlu2 %975 }
 0x1e2   : > { %v981_v13 = vsel %vm304_vm4, %v976_v12, %v978_v11 }
 0x1e3   : > { %1741 = vmatpush.msk.msra.mxu2 %vm311_vm2, %v981_v13 }
 0x1e4   : > { %1742 = vmatmul.msk.f32.vlgmr.msra.gmra.mxu2 %vm307_vm3, %v1740_v1 }
 0x1e9   : > { %v953_v14 = vpop.permute.xlu0 %952  ;;  %v1090_v24 = vpop.permute.xlu2 %1089 }
 0x1ea   : > { %v955_v15 = vpop.permute.xlu1 %954  ;;  %v956_v16 = vsel %vm278_vm0, %v951_v9, %v953_v14 }
 0x1eb   : > { %v957_v17 = vsel %vm278_vm0, %v953_v14, %v955_v15  ;;  %v960_v18 = vsel %vm2036_vm1, %v956_v16, 0.0 }
 0x1ec   : > { %v961_v19 = vsel %vm2048_vm5, %v957_v17, 0.0  ;;  %1745 = vmatpush.msk.msrb.mxu0 %vm311_vm2, %v960_v18 }
 0x1ed   : > { %1747 = vmatpush.msk.msrb.mxu1 %vm311_vm2, %v961_v19  ;;  %1746 = vmatmul.msk.f32.vlgmr.msrb.gmra.mxu0 %vm307_vm3, %v962_v20 }
 0x1ee   : > { %1748 = vmatmul.msk.f32.vlgmr.msrb.gmra.mxu1 %vm307_vm3, %v962_v20 }
 0x1f1   : > { %v1165_v31 = vpop.permute.xlu2 %1164 }
 0x1f2   : > { %v980_v22 = vpop.permute.xlu1 %979 }
 0x1f3   : > { %v982_v23 = vsel %vm304_vm4, %v978_v11, %v980_v22 }
 0x1f4   : > { %1743 = vmatpush.msk.msra.mxu3 %vm311_vm2, %v982_v23 }
 0x1f5   : > { %1744 = vmatmul.msk.f32.vlgmr.msra.gmra.mxu3 %vm307_vm3, %v1740_v1 }
 0x1f9   : > { %v1092_v25 = vpop.permute.xlu0 %1091  ;;  %v1296_v41 = vpop.permute.xlu2 %1295 }
 0x1fa   : > { %v1094_v21 = vpop.permute.xlu1 %1093  ;;  %v1095_v26 = vsel %vm425_vm7, %v1090_v24, %v1092_v25 }
 0x1fb   : > { %v1096_v27 = vsel %vm425_vm7, %v1092_v25, %v1094_v21  ;;  %v1099_v28 = vsel %vm2093_vm9, %v1095_v26, 0.0 }
 0x1fc   : > { %v1100_v30 = vsel %vm2074_vm8, %v1096_v27, 0.0  ;;  %1750 = vmatpush.msk.msrb.mxu2 %vm311_vm2, %v1099_v28 }
 0x1fd   : > { %1752 = vmatpush.msk.msrb.mxu3 %vm311_vm2, %v1100_v30  ;;  %1751 = vmatmul.msk.f32.vlgmr.msrb.gmra.mxu2 %vm307_vm3, %v1749_v29 }
 0x1fe   : > { %1760 = vmatpush.msk.msra.mxu2 %vm311_vm2, %v2179_v53  ;;  %1753 = vmatmul.msk.f32.vlgmr.msrb.gmra.mxu3 %vm307_vm3, %v1749_v29 }
 0x1ff   : > { %1762 = vmatpush.msk.msra.mxu3 %vm311_vm2, %v2181_v54 }
 0x201   : > { %v1167_v32 = vpop.permute.xlu0 %1166  ;;  %v1371_v51 = vpop.permute.xlu2 %1370 }
 0x202   : > { %v1169_v33 = vpop.permute.xlu1 %1168  ;;  %v1170_v34 = vsel %vm501_vm6, %v1165_v31, %v1167_v32 }
 0x203   : > { %v1171_v35 = vsel %vm501_vm6, %v1167_v32, %v1169_v33  ;;  %v1174_v36 = vsel %vm2036_vm1, %v1170_v34, 0.0 }
 0x204   : > { %v1175_v39 = vsel %vm2048_vm5, %v1171_v35, 0.0  ;;  %1755 = vmatpush.msk.msra.mxu0 %vm311_vm2, %v1174_v36 }
 0x205   : > { %1757 = vmatpush.msk.msra.mxu1 %vm311_vm2, %v1175_v39  ;;  %1756 = vmatmul.msk.f32.vlgmr.msra.gmra.mxu0 %vm307_vm3, %v1754_v38 }
 0x206   : > { %1761 = vmatmul.msk.f32.vlgmr.msra.gmra.mxu2 %vm307_vm3, %v1759_v37  ;;  %1758 = vmatmul.msk.f32.vlgmr.msra.gmra.mxu1 %vm307_vm3, %v1754_v38 }
 0x207   : > { %1763 = vmatmul.msk.f32.vlgmr.msra.gmra.mxu3 %vm307_vm3, %v1759_v37 }
 0x20a   : > { %v1300_v40 = vpop.permute.xlu1 %1299 }
 0x211   : > { %v1298_v43 = vpop.permute.xlu0 %1297  ;;  %v1515_v58 = vpop.permute.xlu2 %1514 }
 0x212   : > { %v1301_v44 = vsel %vm633_vm10, %v1296_v41, %v1298_v43  ;;  %v1302_v45 = vsel %vm633_vm10, %v1298_v43, %v1300_v40  ;;  %v1375_v49 = vpop.permute.xlu1 %1374 }
 0x213   : > { %v1305_v47 = vsel %vm2093_vm9, %v1301_v44, 0.0  ;;  %v1306_v48 = vsel %vm2074_vm8, %v1302_v45, 0.0  ;;  %v1598_v45 = vld.sshfl [vmem:[#allocation1] sm:$0xff pattern:$0x75316420] }
 0x214   : > { %1765 = vmatpush.msk.msrb.mxu0 %vm311_vm2, %v1305_v47  ;;  %1767 = vmatpush.msk.msrb.mxu1 %vm311_vm2, %v1306_v48 }
 0x215   : > { %1768 = vmatmul.msk.f32.vlgmr.msrb.gmra.mxu1 %vm307_vm3, %v1764_v46  ;;  %1766 = vmatmul.msk.f32.vlgmr.msrb.gmra.mxu0 %vm307_vm3, %v1764_v46  ;;  %v1599_v46 = vld.sshfl [vmem:[#allocation1 + $0x8] sm:$0xff pattern:$0x75316420] }
 0x219   : > { %v1373_v52 = vpop.permute.xlu0 %1372  ;;  %v1448_v2 = vpop.permute.xlu2 %1447 }
 0x21a   : > { %v1376_v53 = vsel %vm709_vm12, %v1371_v51, %v1373_v52  ;;  %v1377_v54 = vsel %vm709_vm12, %v1373_v52, %v1375_v49 }
 0x21b   : > { %v1380_v56 = vsel %vm2036_vm1, %v1376_v53, 0.0  ;;  %v1381_v57 = vsel %vm2048_vm5, %v1377_v54, 0.0 }
 0x21c   : > { %1770 = vmatpush.msk.msrb.mxu2 %vm311_vm2, %v1380_v56  ;;  %1772 = vmatpush.msk.msrb.mxu3 %vm311_vm2, %v1381_v57 }
 0x21d   : > { %1773 = vmatmul.msk.f32.vlgmr.msrb.gmra.mxu3 %vm307_vm3, %v1769_v55  ;;  %1771 = vmatmul.msk.f32.vlgmr.msrb.gmra.mxu2 %vm307_vm3, %v1769_v55 }
 0x222   : > { %v1519_v59 = vpop.permute.xlu1 %1518 }
 0x229   : > { %v1517_v60 = vpop.permute.xlu0 %1516 }
 0x22a   : > { %v1520_v61 = vsel %vm855_vm13, %v1515_v58, %v1517_v60  ;;  %v1521_v62 = vsel %vm855_vm13, %v1517_v60, %v1519_v59  ;;  %v1452_v3 = vpop.permute.xlu1 %1451 }
 0x22b   : > { %v1524_v50 = vsel %vm2093_vm9, %v1520_v61, 0.0  ;;  %v1525_v63 = vsel %vm2074_vm8, %v1521_v62, 0.0 }
 0x22c   : > { %1780 = vmatpush.msk.msra.mxu2 %vm311_vm2, %v1524_v50  ;;  %1782 = vmatpush.msk.msra.mxu3 %vm311_vm2, %v1525_v63 }
 0x22d   : > { %1781 = vmatmul.msk.f32.vlgmr.msra.gmra.mxu2 %vm307_vm3, %v1779_v42  ;;  %1783 = vmatmul.msk.f32.vlgmr.msra.gmra.mxu3 %vm307_vm3, %v1779_v42 }
 0x231   : > { %v1450_v4 = vpop.permute.xlu0 %1449 }
 0x232   : > { %v1453_v10 = vsel %vm787_vm11, %v1448_v2, %v1450_v4  ;;  %v1454_v0 = vsel %vm787_vm11, %v1450_v4, %v1452_v3  ;;  %v1592_v44 = vpop.permute.xlu1 %1591 }
 0x233   : > { %1775 = vmatpush.msk.msra.mxu0 %vm311_vm2, %v1453_v10  ;;  %1777 = vmatpush.msk.msra.mxu1 %vm311_vm2, %v1454_v0 }
 0x234   : > { %1776 = vmatmul.msk.f32.vlgmr.msra.gmra.mxu0 %vm307_vm3, %v1774_v5  ;;  %1778 = vmatmul.msk.f32.vlgmr.msra.gmra.mxu1 %vm307_vm3, %v1774_v5 }
 0x239   : > { %v1583_v40 = vpop.permute.xlu0 %1582 }
 0x267   : > { %v1007_v7 = vpop.f32.mrf.mxu2 }
 0x26a   : > { %v1056_v12 = vpop.f32.mrf.mxu0 }
 0x26b   : > { %v1076_v11 = vpop.f32.mrf.mxu1  ;;  %v1057_v1 = vadd.f32 %v1056_v12, %v1007_v7 }
 0x278   : > { %v1027_v6 = vpop.f32.mrf.mxu3 }
 0x279   : > { %v1077_v13 = vadd.f32 %v1076_v11, %v1027_v6 }
 0x280   : > { %v1129_v9 = vpop.f32.mrf.mxu2 }
 0x281   : > { %v1149_v8 = vpop.f32.mrf.mxu3  ;;  %v1152_v18 = vadd.f32 %v1129_v9, %v1057_v1 }
 0x282   : > { %v1204_v17 = vpop.f32.mrf.mxu0  ;;  %v1153_v19 = vadd.f32 %v1149_v8, %v1077_v13 }
 0x283   : > { %v1224_v16 = vpop.f32.mrf.mxu1  ;;  %v1227_v20 = vadd.f32 %v1204_v17, %v1152_v18 }
 0x284   : > { %v1228_v22 = vadd.f32 %v1224_v16, %v1153_v19 }
 0x289   : > { %v1260_v15 = vpop.f32.mrf.mxu2 }
 0x28a   : > { %v1280_v14 = vpop.f32.mrf.mxu3  ;;  %v1283_v23 = vadd.f32 %v1260_v15, %v1227_v20 }
 0x28b   : > { %v1284_v27 = vadd.f32 %v1280_v14, %v1228_v22 }
 0x292   : > { %v1355_v21 = vpop.f32.mrf.mxu1  ;;  %v1335_v26 = vpop.f32.mrf.mxu0 }
 0x293   : > { %v1358_v28 = vadd.f32 %v1335_v26, %v1283_v23  ;;  %v1359_v29 = vadd.f32 %v1355_v21, %v1284_v27 }
 0x2a0   : > { %v1430_v24 = vpop.f32.mrf.mxu3  ;;  %v1410_v25 = vpop.f32.mrf.mxu2 }
 0x2a1   : > { %v1434_v30 = vadd.f32 %v1430_v24, %v1359_v29  ;;  %v1433_v31 = vadd.f32 %v1410_v25, %v1358_v28 }
 0x2b0   : > { %v1554_v32 = vpop.f32.mrf.mxu2  ;;  %v1574_v33 = vpop.f32.mrf.mxu3 }
 0x2b1   : > { %v1479_v34 = vpop.f32.mrf.mxu0  ;;  %v1499_v35 = vpop.f32.mrf.mxu1 }
 0x2b2   : > { %v1502_v36 = vadd.f32 %v1479_v34, %v1433_v31  ;;  %v1503_v37 = vadd.f32 %v1499_v35, %v1434_v30 }
 0x2b4   : > { %v1577_v38 = vadd.f32 %v1554_v32, %v1502_v36  ;;  %v1578_v39 = vadd.f32 %v1574_v33, %v1503_v37 }
 0x2b6   : > { %v1585_v41 = vmul.f32 %v1583_v40, %v1577_v38  ;;  %v1586_v43 = vmul.f32 %v1583_v40, %v1578_v39 }
 0x2b8   : > { %v1594_v47 = vadd.f32 %v1592_v44, %v1585_v41  ;;  %v1595_v48 = vadd.f32 %v1592_v44, %v1586_v43 }
 0x2ba   : > { %v1602_v49 = vadd.f32 %v1598_v45, %v1594_v47  ;;  %v1603_v51 = vadd.f32 %v1599_v46, %v1595_v48 }
 0x2bc   : > { %v1605_v52 = vmax.f32 %v1603_v51, 0.0  ;;  %v1604_v53 = vmax.f32 %v1602_v49, 0.0 }
 0x2be   : > { %v1608_v54 = vrot.slane %v1605_v52, 4 }
 0x2c0   : > { %v1609_v55 = vsel %vm311_vm2, %v1604_v53, %v1608_v54 }
 0x2c1   : > { %1611 = vst [vmem:[%s217_s26] sm:$0xff] %v1609_v55 }
 0x2c2   : > { %1870 = shalt.err (!%p1867_p3)
}
 0x2c3   : > { %1792 = dma.vmem_to_hbm [thread:$0]  (%p1985_p5), %s1627_s30, 128, %s1629_s6, %s1613_s22  }
 0x2c4 PF: > { %p1798_p4 = scmp.ge.s32.totalorder %s1905_s21, 2  ;;  %s1640_s16 = sand.u32 1, %s1893_s18  }
 0x2c5   : > { %s1641_s17 = scalar_lea.sflag [#allocation4], %s1640_s16 }
 0x2c6   : > { %p1795_p7 = pnand %p1798_p4, %p1989_p6 }
 0x2c8   : > { %p1796_p8 = pneg %p1795_p7 }
 0x2ca   : > { %1888 = dma.done.wait (%p1796_p8), %s1641_s17, 128  }
 0x2cb   : > { %1890 = vsyncadd (%p1796_p8), %s1641_s17, 4294967168  ;;  %p15_p9 = scmp.ge.s32.totalorder %s1972_s24, 4   ;;  %s2361_s18 = smov %s1897_s19 }
 0x2cc   : > { %s2362_s19 = smov %s1901_s20  ;;  %s2363_s20 = smov %s1983_s27 }
 0x2cd   : > { %s2364_s21 = smov %s1972_s24  ;;  %17 = sbr.rel (!%p15_p9) target bundleno = 3 (0x3), region = 109 }
 0x2d2   :  { %1647 = vsyncpa [#allocation4], 1 }
 0x2d3   :  { %1649 = vsyncpa [#allocation4 + $0x1], 1 }

</bundles_post_ra>
